<compile_context>
chip_gen: v5e
topology: v5e:2x2
jax: 0.10.0
libtpu: 0.0.40
codegen_flags: <defaults>
</compile_context>

<pallas_src>
import functools

import jax
import jax.numpy as jnp
from jax.experimental import pallas as pl
from jax.experimental.pallas import tpu as pltpu


# ----------------------------------------------------------------------------
# Kernel
# ----------------------------------------------------------------------------
def _gemv_awq_kernel(x_ref, qw_ref, s_ref, z_ref, b_ref, out_ref, acc_ref, *,
                     dequant_dtype):
    # x_ref  : (8, M, TKP)  bf16   plane-major activations (TKP = tile_k // 8)
    # qw_ref : (TKP, TN)    int32  per-group planar int4 packed weight chunk
    # s_ref  : (TG, TN)     bf16   AWQ per-group scales   (TG = tile_k // 64)
    # z_ref  : (TG, TN)     bf16   AWQ per-group zero points
    # b_ref  : (1, TN)      bf16   bias
    # out_ref: (M, TN)      bf16
    # acc_ref: (M, TN)      f32    accumulator scratch (lives across K chunks)
    c = pl.program_id(1)

    @pl.when(c == 0)
    def _init():
        acc_ref[...] = jnp.zeros_like(acc_ref)

    TKP, TN = qw_ref.shape
    TG = s_ref.shape[0]
    assert TKP == 8 * TG

    packed = qw_ref[...]                                       # (TKP, TN) int32

    # Hoist the per-group -> per-packed-row broadcast of scales / zeros out of
    # the plane loop (one broadcast each per chunk, reused by all 8 planes).
    s_full = jnp.broadcast_to(
        s_ref[...].astype(dequant_dtype)[:, None, :], (TG, 8, TN)
    ).reshape(TKP, TN)
    z_full = jnp.broadcast_to(
        z_ref[...].astype(dequant_dtype)[:, None, :], (TG, 8, TN)
    ).reshape(TKP, TN)

    acc = acc_ref[...]
    # Static unroll over the 8 nibble planes: dequantize one (TKP, TN) plane
    # and immediately feed it to the MXU.  The full K x TN weight is never
    # materialized; intermediates are bounded by the chunk size.
    for j in range(8):
        nib = (packed >> (4 * j)) & 0xF                        # int32
        wj = ((nib.astype(dequant_dtype) - z_full) * s_full
              ).astype(jnp.bfloat16)                           # (TKP, TN) bf16
        acc = acc + jnp.dot(x_ref[j], wj,
                            preferred_element_type=jnp.float32)
    acc_ref[...] = acc

    @pl.when(c == pl.num_programs(1) - 1)
    def _finalize():
        out_ref[...] = (acc_ref[...]
                        + b_ref[...].astype(jnp.float32)).astype(out_ref.dtype)


# ----------------------------------------------------------------------------
# Tile-size selection
# ----------------------------------------------------------------------------
def _pick_tile_n(N, target=1024):
    assert N % 128 == 0, "out_features must be a multiple of 128"
    tn = min(target, N)
    while N % tn != 0:
        tn -= 128
    # Prefer >= 2 N tiles so the "parallel" axis can be split across the two
    # TensorCores of a v7x chip (free ~2x on this VPU-bound kernel).
    if N // tn < 2 and N >= 256 and (N // 2) % 128 == 0:
        tn = N // 2
    return tn


def _pick_tile_k(K, target=2048):
    if K <= target:
        return K
    for tk in (target, 1024):
        if tk % 1024 == 0 and K % tk == 0:
            return tk
    # TODO(synk): K not a multiple of 1024 -> fall back to a single K chunk
    # (still correct; per-step VMEM then grows with K).
    return K


# ----------------------------------------------------------------------------
# Wrapper
# ----------------------------------------------------------------------------
def gemv_awq_forward(x, qweight, wscales, wzeros, bias=None, *,
                     tile_n=1024, tile_k=2048,
                     dequant_dtype=jnp.bfloat16):
    """x: (..., K) bf16; qweight: (K//8, N) int32 (per-group planar int4);
    wscales/wzeros: (K//64, N) bf16; bias: (N,) bf16 or None.
    Returns (..., N) bf16.

    dequant_dtype=jnp.bfloat16 is the fast path on v6e/v7x (bf16 VALU) and is
    numerically identical to f32 dequant; pass jnp.float32 on v5e.
    """
    K = x.shape[-1]
    G, N = wscales.shape
    assert x.dtype == jnp.bfloat16
    assert K % 64 == 0 and G == K // 64
    assert qweight.shape == (K // 8, N)
    assert wzeros.shape == wscales.shape

    xm = x.reshape(-1, K)
    M = xm.shape[0]

    tn = _pick_tile_n(N, tile_n)
    tk = _pick_tile_k(K, tile_k)
    tkp = tk // 8            # packed rows per K chunk
    tg = tk // 64            # groups per K chunk
    n_tiles = N // tn
    k_tiles = K // tk

    if bias is None:
        bias = jnp.zeros((N,), jnp.bfloat16)
    assert bias.shape == (N,)
    bias2 = bias.reshape(1, N)

    # Plane-major activation layout matching the per-group planar packing:
    #   x_planes[j, m, 8g + i] = x[m, 64g + 8j + i]
    # Tiny (M x K) reshuffle done once outside the kernel (M is small — GEMV).
    x_planes = (xm.reshape(M, G, 8, 8)
                  .transpose(2, 0, 1, 3)
                  .reshape(8, M, K // 8))

    kernel = functools.partial(_gemv_awq_kernel, dequant_dtype=dequant_dtype)

    out = pl.pallas_call(
        kernel,
        out_shape=jax.ShapeDtypeStruct((M, N), jnp.bfloat16),
        grid_spec=pltpu.PrefetchScalarGridSpec(
            num_scalar_prefetch=0,
            grid=(n_tiles, k_tiles),                       # K (reduction) last
            in_specs=[
                pl.BlockSpec((8, M, tkp), lambda n, c: (0, 0, c)),  # x planes
                pl.BlockSpec((tkp, tn), lambda n, c: (c, n)),       # packed w
                pl.BlockSpec((tg, tn), lambda n, c: (c, n)),        # scales
                pl.BlockSpec((tg, tn), lambda n, c: (c, n)),        # zeros
                pl.BlockSpec((1, tn), lambda n, c: (0, n)),         # bias
            ],
            out_specs=pl.BlockSpec((M, tn), lambda n, c: (0, n)),
            scratch_shapes=[pltpu.VMEM((M, tn), jnp.float32)],
        ),
        compiler_params=pltpu.CompilerParams(
            dimension_semantics=("parallel", "arbitrary"),
            vmem_limit_bytes=32 * 1024 * 1024,
        ),
    )(x_planes, qweight, wscales, wzeros, bias2)
    return out.reshape(*x.shape[:-1], N)


# ----------------------------------------------------------------------------
# Packing helper (parameter-setup glue) + pure-JAX reference
# ----------------------------------------------------------------------------
def pack_int4_group_planar(q4):
    """q4: (K, N) int32 values in [0, 15] -> (K//8, N) int32.
    packed[8g + i, n] nibble j = q4[64g + 8j + i, n]."""
    K, N = q4.shape
    assert K % 64 == 0
    G = K // 64
    q = q4.reshape(G, 8, 8, N).astype(jnp.uint32)            # [g, j, i, n]
    packed = functools.reduce(
        jnp.bitwise_or, [q[:, j] << jnp.uint32(4 * j) for j in range(8)])
    return jax.lax.bitcast_convert_type(packed, jnp.int32).reshape(K // 8, N)


def reference(x, qweight, wscales, wzeros, bias):
    K8, N = qweight.shape
    K = K8 * 8
    G = K // 64
    p = qweight.reshape(G, 8, N)                              # [g, i, n]
    planes = [(p >> (4 * j)) & 0xF for j in range(8)]         # plane j
    q = jnp.stack(planes, axis=1).reshape(K, N)               # row 64g+8j+i
    q = q.astype(jnp.float32)
    s = jnp.repeat(wscales.astype(jnp.float32), 64, axis=0)
    z = jnp.repeat(wzeros.astype(jnp.float32), 64, axis=0)
    w = ((q - z) * s).astype(jnp.bfloat16)
    xm = x.reshape(-1, K)
    out = jnp.dot(xm, w, preferred_element_type=jnp.float32)
    out = out + bias.astype(jnp.float32)[None, :]
    return out.astype(jnp.bfloat16).reshape(*x.shape[:-1], N)


# ----------------------------------------------------------------------------
# Test
# ----------------------------------------------------------------------------
if __name__ == "__main__":
    in_features = 256      # K (multiple of group_size=64)
    out_features = 512     # N
    group_size = 64

    key = jax.random.PRNGKey(0)
    kx, kq, ks, kz, kb = jax.random.split(key, 5)

    # GEMV activations: (batch=2, seq=4, in_features) bf16 -> M = 8 rows.
    x = jax.random.normal(kx, (2, 4, in_features), dtype=jnp.float32
                          ).astype(jnp.bfloat16)

    # Synthetic int4 AWQ parameters.
    q4 = jax.random.randint(kq, (in_features, out_features), 0, 16,
                            dtype=jnp.int32)
    qweight = pack_int4_group_planar(q4)                      # (K//8, N)
    wscales = (0.02 * jax.random.uniform(
        ks, (in_features // group_size, out_features),
        minval=0.5, maxval=1.5, dtype=jnp.float32)).astype(jnp.bfloat16)
    wzeros = jax.random.randint(
        kz, (in_features // group_size, out_features), 0, 16,
        dtype=jnp.int32).astype(jnp.bfloat16)
    bias = (0.1 * jax.random.normal(kb, (out_features,), dtype=jnp.float32)
            ).astype(jnp.bfloat16)

    out = gemv_awq_forward(x, qweight, wscales, wzeros, bias)
    out = jax.block_until_ready(out)

    ref = reference(x, qweight, wscales, wzeros, bias)

    assert out.shape == (2, 4, out_features)
    assert jnp.allclose(out.astype(jnp.float32), ref.astype(jnp.float32),
                        atol=2e-2, rtol=2e-2)

    print("KERNEL_OK")
</pallas_src>

<mosaic_0001>
module attributes {stable_mosaic.version = 11 : i64} {
  func.func @_gemv_awq_kernel(%arg0: i32, %arg1: i32, %arg2: memref<8x8x32xbf16, #tpu.memory_space<vmem>>, %arg3: memref<32x256xi32, #tpu.memory_space<vmem>>, %arg4: memref<4x256xbf16, #tpu.memory_space<vmem>>, %arg5: memref<4x256xbf16, #tpu.memory_space<vmem>>, %arg6: memref<1x256xbf16, #tpu.memory_space<vmem>>, %arg7: memref<8x256xbf16, #tpu.memory_space<vmem>>, %arg8: memref<8x256xf32, #tpu.memory_space<vmem>>) attributes {dimension_semantics = [#tpu.dimension_semantics<parallel>, #tpu.dimension_semantics<arbitrary>], iteration_bounds = array<i64: 2, 1>, scalar_prefetch = 0 : i64, scratch_operands = 1 : i64, tpu.core_type = #tpu.core_type<tc>, window_params = [{transform_indices = @transform_0, window_bounds = array<i64: 8, 8, 32>}, {transform_indices = @transform_1, window_bounds = array<i64: 32, 256>}, {transform_indices = @transform_2, window_bounds = array<i64: 4, 256>}, {transform_indices = @transform_3, window_bounds = array<i64: 4, 256>}, {transform_indices = @transform_4, window_bounds = array<i64: 1, 256>}, {transform_indices = @transform_5, window_bounds = array<i64: 8, 256>}]} {
    %c0_i32 = arith.constant 0 : i32
    %0 = arith.cmpi eq, %arg1, %c0_i32 : i32
    %1 = arith.extui %0 : i1 to i32
    %c0_i32_0 = arith.constant 0 : i32
    %2 = arith.cmpi ne, %1, %c0_i32_0 : i32
    scf.if %2 {
      %cst_44 = arith.constant 0.000000e+00 : f32
      %107 = vector.broadcast %cst_44 : f32 to vector<8x256xf32>
      %c0_45 = arith.constant 0 : index
      %c0_46 = arith.constant 0 : index
      %108 = vector.load %arg8[%c0_45, %c0_46] : memref<8x256xf32, #tpu.memory_space<vmem>>, vector<8x256xf32>
      tpu.vector_store %arg8[%c0_45, %c0_46], %107 {strides = array<i32>} : memref<8x256xf32, #tpu.memory_space<vmem>>, vector<8x256xf32>,
    } else {
    }
    %c0 = arith.constant 0 : index
    %c0_1 = arith.constant 0 : index
    %3 = vector.load %arg3[%c0, %c0_1] : memref<32x256xi32, #tpu.memory_space<vmem>>, vector<32x256xi32>
    %c0_2 = arith.constant 0 : index
    %c0_3 = arith.constant 0 : index
    %4 = vector.load %arg4[%c0_2, %c0_3] : memref<4x256xbf16, #tpu.memory_space<vmem>>, vector<4x256xbf16>
    %5 = vector.shape_cast %4 : vector<4x256xbf16> to vector<4x1x256xbf16>
    %6 = vector.shape_cast %5 : vector<4x1x256xbf16> to vector<4x1x256xbf16>
    %7 = vector.broadcast %6 : vector<4x1x256xbf16> to vector<4x8x256xbf16>
    %8 = vector.shape_cast %7 : vector<4x8x256xbf16> to vector<32x256xbf16>
    %c0_4 = arith.constant 0 : index
    %c0_5 = arith.constant 0 : index
    %9 = vector.load %arg5[%c0_4, %c0_5] : memref<4x256xbf16, #tpu.memory_space<vmem>>, vector<4x256xbf16>
    %10 = vector.shape_cast %9 : vector<4x256xbf16> to vector<4x1x256xbf16>
    %11 = vector.shape_cast %10 : vector<4x1x256xbf16> to vector<4x1x256xbf16>
    %12 = vector.broadcast %11 : vector<4x1x256xbf16> to vector<4x8x256xbf16>
    %13 = vector.shape_cast %12 : vector<4x8x256xbf16> to vector<32x256xbf16>
    %c0_6 = arith.constant 0 : index
    %c0_7 = arith.constant 0 : index
    %14 = vector.load %arg8[%c0_6, %c0_7] : memref<8x256xf32, #tpu.memory_space<vmem>>, vector<8x256xf32>
    %c0_i32_8 = arith.constant 0 : i32
    %15 = vector.broadcast %c0_i32_8 : i32 to vector<32x256xi32>
    %16 = arith.shrsi %3, %15 : vector<32x256xi32>
    %c15_i32 = arith.constant 15 : i32
    %17 = vector.broadcast %c15_i32 : i32 to vector<32x256xi32>
    %18 = arith.andi %16, %17 : vector<32x256xi32>
    %19 = arith.sitofp %18 : vector<32x256xi32> to vector<32x256xbf16>
    %20 = arith.subf %19, %13 : vector<32x256xbf16>
    %21 = arith.mulf %20, %8 : vector<32x256xbf16>
    %c0_9 = arith.constant 0 : index
    %c0_10 = arith.constant 0 : index
    %c0_11 = arith.constant 0 : index
    %22 = vector.load %arg2[%c0_9, %c0_10, %c0_11] : memref<8x8x32xbf16, #tpu.memory_space<vmem>>, vector<1x8x32xbf16>
    %23 = vector.shape_cast %22 : vector<1x8x32xbf16> to vector<8x32xbf16>
    %cst = arith.constant dense<0.000000e+00> : vector<8x256xf32>
    %24 = tpu.matmul %23, %21, %cst {dimension_numbers = #tpu.dot_dimension_numbers<[1], [0], [0], [1], [0, 0, 1, 1], [], []>} : vector<8x32xbf16>, vector<32x256xbf16>, vector<8x256xf32> -> vector<8x256xf32>
    %25 = arith.addf %14, %24 : vector<8x256xf32>
    %c4_i32 = arith.constant 4 : i32
    %26 = vector.broadcast %c4_i32 : i32 to vector<32x256xi32>
    %27 = arith.shrsi %3, %26 : vector<32x256xi32>
    %c15_i32_12 = arith.constant 15 : i32
    %28 = vector.broadcast %c15_i32_12 : i32 to vector<32x256xi32>
    %29 = arith.andi %27, %28 : vector<32x256xi32>
    %30 = arith.sitofp %29 : vector<32x256xi32> to vector<32x256xbf16>
    %31 = arith.subf %30, %13 : vector<32x256xbf16>
    %32 = arith.mulf %31, %8 : vector<32x256xbf16>
    %c1 = arith.constant 1 : index
    %c0_13 = arith.constant 0 : index
    %c0_14 = arith.constant 0 : index
    %33 = vector.load %arg2[%c1, %c0_13, %c0_14] : memref<8x8x32xbf16, #tpu.memory_space<vmem>>, vector<1x8x32xbf16>
    %34 = vector.shape_cast %33 : vector<1x8x32xbf16> to vector<8x32xbf16>
    %cst_15 = arith.constant dense<0.000000e+00> : vector<8x256xf32>
    %35 = tpu.matmul %34, %32, %cst_15 {dimension_numbers = #tpu.dot_dimension_numbers<[1], [0], [0], [1], [0, 0, 1, 1], [], []>} : vector<8x32xbf16>, vector<32x256xbf16>, vector<8x256xf32> -> vector<8x256xf32>
    %36 = arith.addf %25, %35 : vector<8x256xf32>
    %c8_i32 = arith.constant 8 : i32
    %37 = vector.broadcast %c8_i32 : i32 to vector<32x256xi32>
    %38 = arith.shrsi %3, %37 : vector<32x256xi32>
    %c15_i32_16 = arith.constant 15 : i32
    %39 = vector.broadcast %c15_i32_16 : i32 to vector<32x256xi32>
    %40 = arith.andi %38, %39 : vector<32x256xi32>
    %41 = arith.sitofp %40 : vector<32x256xi32> to vector<32x256xbf16>
    %42 = arith.subf %41, %13 : vector<32x256xbf16>
    %43 = arith.mulf %42, %8 : vector<32x256xbf16>
    %c2 = arith.constant 2 : index
    %c0_17 = arith.constant 0 : index
    %c0_18 = arith.constant 0 : index
    %44 = vector.load %arg2[%c2, %c0_17, %c0_18] : memref<8x8x32xbf16, #tpu.memory_space<vmem>>, vector<1x8x32xbf16>
    %45 = vector.shape_cast %44 : vector<1x8x32xbf16> to vector<8x32xbf16>
    %cst_19 = arith.constant dense<0.000000e+00> : vector<8x256xf32>
    %46 = tpu.matmul %45, %43, %cst_19 {dimension_numbers = #tpu.dot_dimension_numbers<[1], [0], [0], [1], [0, 0, 1, 1], [], []>} : vector<8x32xbf16>, vector<32x256xbf16>, vector<8x256xf32> -> vector<8x256xf32>
    %47 = arith.addf %36, %46 : vector<8x256xf32>
    %c12_i32 = arith.constant 12 : i32
    %48 = vector.broadcast %c12_i32 : i32 to vector<32x256xi32>
    %49 = arith.shrsi %3, %48 : vector<32x256xi32>
    %c15_i32_20 = arith.constant 15 : i32
    %50 = vector.broadcast %c15_i32_20 : i32 to vector<32x256xi32>
    %51 = arith.andi %49, %50 : vector<32x256xi32>
    %52 = arith.sitofp %51 : vector<32x256xi32> to vector<32x256xbf16>
    %53 = arith.subf %52, %13 : vector<32x256xbf16>
    %54 = arith.mulf %53, %8 : vector<32x256xbf16>
    %c3 = arith.constant 3 : index
    %c0_21 = arith.constant 0 : index
    %c0_22 = arith.constant 0 : index
    %55 = vector.load %arg2[%c3, %c0_21, %c0_22] : memref<8x8x32xbf16, #tpu.memory_space<vmem>>, vector<1x8x32xbf16>
    %56 = vector.shape_cast %55 : vector<1x8x32xbf16> to vector<8x32xbf16>
    %cst_23 = arith.constant dense<0.000000e+00> : vector<8x256xf32>
    %57 = tpu.matmul %56, %54, %cst_23 {dimension_numbers = #tpu.dot_dimension_numbers<[1], [0], [0], [1], [0, 0, 1, 1], [], []>} : vector<8x32xbf16>, vector<32x256xbf16>, vector<8x256xf32> -> vector<8x256xf32>
    %58 = arith.addf %47, %57 : vector<8x256xf32>
    %c16_i32 = arith.constant 16 : i32
    %59 = vector.broadcast %c16_i32 : i32 to vector<32x256xi32>
    %60 = arith.shrsi %3, %59 : vector<32x256xi32>
    %c15_i32_24 = arith.constant 15 : i32
    %61 = vector.broadcast %c15_i32_24 : i32 to vector<32x256xi32>
    %62 = arith.andi %60, %61 : vector<32x256xi32>
    %63 = arith.sitofp %62 : vector<32x256xi32> to vector<32x256xbf16>
    %64 = arith.subf %63, %13 : vector<32x256xbf16>
    %65 = arith.mulf %64, %8 : vector<32x256xbf16>
    %c4 = arith.constant 4 : index
    %c0_25 = arith.constant 0 : index
    %c0_26 = arith.constant 0 : index
    %66 = vector.load %arg2[%c4, %c0_25, %c0_26] : memref<8x8x32xbf16, #tpu.memory_space<vmem>>, vector<1x8x32xbf16>
    %67 = vector.shape_cast %66 : vector<1x8x32xbf16> to vector<8x32xbf16>
    %cst_27 = arith.constant dense<0.000000e+00> : vector<8x256xf32>
    %68 = tpu.matmul %67, %65, %cst_27 {dimension_numbers = #tpu.dot_dimension_numbers<[1], [0], [0], [1], [0, 0, 1, 1], [], []>} : vector<8x32xbf16>, vector<32x256xbf16>, vector<8x256xf32> -> vector<8x256xf32>
    %69 = arith.addf %58, %68 : vector<8x256xf32>
    %c20_i32 = arith.constant 20 : i32
    %70 = vector.broadcast %c20_i32 : i32 to vector<32x256xi32>
    %71 = arith.shrsi %3, %70 : vector<32x256xi32>
    %c15_i32_28 = arith.constant 15 : i32
    %72 = vector.broadcast %c15_i32_28 : i32 to vector<32x256xi32>
    %73 = arith.andi %71, %72 : vector<32x256xi32>
    %74 = arith.sitofp %73 : vector<32x256xi32> to vector<32x256xbf16>
    %75 = arith.subf %74, %13 : vector<32x256xbf16>
    %76 = arith.mulf %75, %8 : vector<32x256xbf16>
    %c5 = arith.constant 5 : index
    %c0_29 = arith.constant 0 : index
    %c0_30 = arith.constant 0 : index
    %77 = vector.load %arg2[%c5, %c0_29, %c0_30] : memref<8x8x32xbf16, #tpu.memory_space<vmem>>, vector<1x8x32xbf16>
    %78 = vector.shape_cast %77 : vector<1x8x32xbf16> to vector<8x32xbf16>
    %cst_31 = arith.constant dense<0.000000e+00> : vector<8x256xf32>
    %79 = tpu.matmul %78, %76, %cst_31 {dimension_numbers = #tpu.dot_dimension_numbers<[1], [0], [0], [1], [0, 0, 1, 1], [], []>} : vector<8x32xbf16>, vector<32x256xbf16>, vector<8x256xf32> -> vector<8x256xf32>
    %80 = arith.addf %69, %79 : vector<8x256xf32>
    %c24_i32 = arith.constant 24 : i32
    %81 = vector.broadcast %c24_i32 : i32 to vector<32x256xi32>
    %82 = arith.shrsi %3, %81 : vector<32x256xi32>
    %c15_i32_32 = arith.constant 15 : i32
    %83 = vector.broadcast %c15_i32_32 : i32 to vector<32x256xi32>
    %84 = arith.andi %82, %83 : vector<32x256xi32>
    %85 = arith.sitofp %84 : vector<32x256xi32> to vector<32x256xbf16>
    %86 = arith.subf %85, %13 : vector<32x256xbf16>
    %87 = arith.mulf %86, %8 : vector<32x256xbf16>
    %c6 = arith.constant 6 : index
    %c0_33 = arith.constant 0 : index
    %c0_34 = arith.constant 0 : index
    %88 = vector.load %arg2[%c6, %c0_33, %c0_34] : memref<8x8x32xbf16, #tpu.memory_space<vmem>>, vector<1x8x32xbf16>
    %89 = vector.shape_cast %88 : vector<1x8x32xbf16> to vector<8x32xbf16>
    %cst_35 = arith.constant dense<0.000000e+00> : vector<8x256xf32>
    %90 = tpu.matmul %89, %87, %cst_35 {dimension_numbers = #tpu.dot_dimension_numbers<[1], [0], [0], [1], [0, 0, 1, 1], [], []>} : vector<8x32xbf16>, vector<32x256xbf16>, vector<8x256xf32> -> vector<8x256xf32>
    %91 = arith.addf %80, %90 : vector<8x256xf32>
    %c28_i32 = arith.constant 28 : i32
    %92 = vector.broadcast %c28_i32 : i32 to vector<32x256xi32>
    %93 = arith.shrsi %3, %92 : vector<32x256xi32>
    %c15_i32_36 = arith.constant 15 : i32
    %94 = vector.broadcast %c15_i32_36 : i32 to vector<32x256xi32>
    %95 = arith.andi %93, %94 : vector<32x256xi32>
    %96 = arith.sitofp %95 : vector<32x256xi32> to vector<32x256xbf16>
    %97 = arith.subf %96, %13 : vector<32x256xbf16>
    %98 = arith.mulf %97, %8 : vector<32x256xbf16>
    %c7 = arith.constant 7 : index
    %c0_37 = arith.constant 0 : index
    %c0_38 = arith.constant 0 : index
    %99 = vector.load %arg2[%c7, %c0_37, %c0_38] : memref<8x8x32xbf16, #tpu.memory_space<vmem>>, vector<1x8x32xbf16>
    %100 = vector.shape_cast %99 : vector<1x8x32xbf16> to vector<8x32xbf16>
    %cst_39 = arith.constant dense<0.000000e+00> : vector<8x256xf32>
    %101 = tpu.matmul %100, %98, %cst_39 {dimension_numbers = #tpu.dot_dimension_numbers<[1], [0], [0], [1], [0, 0, 1, 1], [], []>} : vector<8x32xbf16>, vector<32x256xbf16>, vector<8x256xf32> -> vector<8x256xf32>
    %102 = arith.addf %91, %101 : vector<8x256xf32>
    %c0_40 = arith.constant 0 : index
    %c0_41 = arith.constant 0 : index
    %103 = vector.load %arg8[%c0_40, %c0_41] : memref<8x256xf32, #tpu.memory_space<vmem>>, vector<8x256xf32>
    tpu.vector_store %arg8[%c0_40, %c0_41], %102 {strides = array<i32>} : memref<8x256xf32, #tpu.memory_space<vmem>>, vector<8x256xf32>,
    %c0_i32_42 = arith.constant 0 : i32
    %104 = arith.cmpi eq, %arg1, %c0_i32_42 : i32
    %105 = arith.extui %104 : i1 to i32
    %c0_i32_43 = arith.constant 0 : i32
    %106 = arith.cmpi ne, %105, %c0_i32_43 : i32
    scf.if %106 {
      %c0_44 = arith.constant 0 : index
      %c0_45 = arith.constant 0 : index
      %107 = vector.load %arg8[%c0_44, %c0_45] : memref<8x256xf32, #tpu.memory_space<vmem>>, vector<8x256xf32>
      %c0_46 = arith.constant 0 : index
      %c0_47 = arith.constant 0 : index
      %108 = vector.load %arg6[%c0_46, %c0_47] : memref<1x256xbf16, #tpu.memory_space<vmem>>, vector<1x256xbf16>
      %109 = arith.extf %108 : vector<1x256xbf16> to vector<1x256xf32>
      %110 = vector.broadcast %109 : vector<1x256xf32> to vector<8x256xf32>
      %111 = arith.addf %107, %110 : vector<8x256xf32>
      %112 = arith.truncf %111 : vector<8x256xf32> to vector<8x256xbf16>
      %c0_48 = arith.constant 0 : index
      %c0_49 = arith.constant 0 : index
      %113 = vector.load %arg7[%c0_48, %c0_49] : memref<8x256xbf16, #tpu.memory_space<vmem>>, vector<8x256xbf16>
      tpu.vector_store %arg7[%c0_48, %c0_49], %112 {strides = array<i32>} : memref<8x256xbf16, #tpu.memory_space<vmem>>, vector<8x256xbf16>,
    } else {
    }
    return
  }
  func.func @transform_0(%arg0: i32, %arg1: i32) -> (i32, i32, i32) {
    %c0_i32 = arith.constant 0 : i32
    %c0_i32_0 = arith.constant 0 : i32
    %c0_i32_1 = arith.constant 0 : i32
    return %c0_i32, %c0_i32_0, %arg1 : i32, i32, i32
  }
  func.func @transform_1(%arg0: i32, %arg1: i32) -> (i32, i32) {
    %c0_i32 = arith.constant 0 : i32
    return %arg1, %arg0 : i32, i32
  }
  func.func @transform_2(%arg0: i32, %arg1: i32) -> (i32, i32) {
    %c0_i32 = arith.constant 0 : i32
    return %arg1, %arg0 : i32, i32
  }
  func.func @transform_3(%arg0: i32, %arg1: i32) -> (i32, i32) {
    %c0_i32 = arith.constant 0 : i32
    return %arg1, %arg0 : i32, i32
  }
  func.func @transform_4(%arg0: i32, %arg1: i32) -> (i32, i32) {
    %c0_i32 = arith.constant 0 : i32
    %c0_i32_0 = arith.constant 0 : i32
    return %c0_i32, %arg0 : i32, i32
  }
  func.func @transform_5(%arg0: i32, %arg1: i32) -> (i32, i32) {
    %c0_i32 = arith.constant 0 : i32
    %c0_i32_0 = arith.constant 0 : i32
    return %c0_i32, %arg0 : i32, i32
  }
}

</mosaic_0001>

<bundles_post_ra>
// kernel: tpu_custom_call.1
= control target key start
LH: loop header
LB: loop body
LE: loop exit
PB: predicated region body
PF: predicated region fallthrough
CT: control target
= control target key end

     0   :  { %s2594_s0 = inlined_call_operand.hbm [shape: bf16[8,8,32], index: 0, kind: input, shape index: {}]   ;;  %s2595_s1 = inlined_call_operand.hbm [shape: s32[32,512], index: 1, kind: input, shape index: {}]   ;;  %s2596_s2 = inlined_call_operand.hbm [shape: bf16[4,512], index: 2, kind: input, shape index: {}]   ;;  %s2597_s3 = inlined_call_operand.hbm [shape: bf16[4,512], index: 3, kind: input, shape index: {}]   ;;  %s2598_s4 = inlined_call_operand.hbm [shape: bf16[1,512], index: 4, kind: input, shape index: {}]   ;;  %s2599_s5 = inlined_call_operand.hbm [shape: bf16[8,512], index: 5, kind: output, shape index: {}]  }
   0x1   :  { %2604 = sst [smem:[#allocation21_spill]] %s2594_s0 }
   0x2   :  { %2605 = sst [smem:[#allocation22_spill]] %s2595_s1 }
   0x3   :  { %2606 = sst [smem:[#allocation23_spill]] %s2596_s2 }
   0x4   :  { %2607 = sst [smem:[#allocation24_spill]] %s2597_s3 }
   0x5   :  { %10 = vsyncpa [#allocation4], 0 }
   0x6   :  { %11 = vsyncpa [#allocation7], 0 }
   0x7   :  { %13 = vsyncpa [#allocation7 + $0x1], 0 }
   0x8   :  { %14 = vsyncpa [#allocation10], 0 }
   0x9   :  { %16 = vsyncpa [#allocation10 + $0x1], 0 }
   0xa   :  { %17 = vsyncpa [#allocation5], 0 }
   0xb   :  { %19 = vsyncpa [#allocation5 + $0x1], 0  ;;  %s2068_s18 = smov 0   ;;  %s2070_s19 = smov 0  }
   0xc   :  { %s2072_s20 = smov 0   ;;  %s2074_s21 = smov 0  }
   0xd   :  { %s2076_s22 = smov 0   ;;  %s2078_s23 = smov 0  }
   0xe LB: > { %2608 = sst [smem:[#allocation17_spill]] %s2018_s20  ;;  %s37_s24 = sadd.s32 1, %s2026_s22  ;;  %s2030_s23 = sphi %s2078_s23, %s25_s23   ;;  %s2026_s22 = sphi %s2076_s22, %s2629_s22   ;;  %s2022_s21 = sphi %s2074_s21, %s2628_s21   ;;  %s2018_s20 = sphi %s2072_s20, %s2624_s20   ;;  %s2014_s19 = sphi %s2070_s19, %s2627_s19   ;;  %s2010_s18 = sphi %s2068_s18, %s2626_s18  }
   0xf   : > { %2609 = sst [smem:[#allocation18_spill]] %s2030_s23  ;;  %s72_s25 = sadd.s32 1, %s2018_s20 }
  0x10   : > { %p39_p0 = scmp.ge.s32.totalorder %s37_s24, 2  ;;  %p79_p1 = scmp.ne.s32.totalorder %s2018_s20, %s2014_s19 }
  0x11   : > { %p80_p2 = scmp.eq.s32.totalorder %s2030_s23, 0  ;;  %p1637_p3 = scmp.ge.s32.totalorder %s2030_s23, 2 }
  0x12   : > { %s2631_s24 = smov (%p39_p0, %s37_s24), 0  ;;  %p1729_p5 = scmp.lt.s32.totalorder %s2030_s23, 2 }
  0x13   : > { %2610 = sst [smem:[#allocation19_spill]] %s2631_s24  ;;  %p2109_p4 = por %p80_p2, %p79_p1 }
  0x14   : > { %s68_s27 = ssub.s32 %s2026_s22, %s2631_s24  ;;  %s233_s28 = sand.u32 1, %s2030_s23  }
  0x15   : > { %p70_p6 = scmp.eq.s32.totalorder %s68_s27, 0  ;;  %s2118_s29 = sand.u32 1, %s2018_s20  }
  0x16   : > { %s1689_s30 = sshll.u32 %s2026_s22, 4  ;;  %s1638_s7 = sshll.u32 %s2118_s29, 6 }
  0x17   : > { %s2122_s6 = scalar_select %p70_p6, %s2018_s20, %s72_s25  }
  0x18   : > { %s2613_s1 = sld [smem:[#allocation22_spill]]  ;;  %s237_s12 = scalar_lea.vmem [#allocation6], %s1638_s7 }
  0x19   : > { %2612 = sst [smem:[#allocation20_spill]] %s2122_s6  ;;  %s248_s13 = sshll.u32 %s237_s12, 4  ;;  %s249_s13 = int_to_ptr.vmem [resolvable:$true] %s248_s13 }
  0x1a   : > { %p2132_p7 = pnand %p1729_p5, %p2109_p4  ;;  %s2136_s15 = scalar_lea.sflag [#allocation7], %s233_s28 }
  0x1b   : > { %s2032_s16 = smov 512   ;;  %s2033_s17 = smov 256  }
  0x1c   : > { %s2034_s25 = smov 16   ;;  %s1641_s26 = sshll.u32 %s2118_s29, 2 }
  0x1d   : > { %s1690_s27 = sshll.u32 %s2026_s22, 2  ;;  %s2615_s2 = sld [smem:[#allocation23_spill]] }
  0x1e   : > { %s245_s10 = scalar_lea.hbm %s2613_s1, %s1689_s30  ;;  %s2616_s3 = sld [smem:[#allocation24_spill]] }
  0x1f   : > { %s246_s11 = sshll.u32 %s245_s10, 4  ;;  %s284_s1 = scalar_lea.vmem [#allocation9], %s1641_s26  ;;  %s247_s11 = int_to_ptr.hbm [resolvable:$true] %s246_s11 }
  0x20   : > { %1714 = dma.hbm_to_vmem [thread:$0]  (!%p2132_p7), %s247_s11, 1024, %s249_s13, %s2136_s15, %s2032_s16, %s2033_s17, %s2034_s25  }
  0x21   : > { %s295_s24 = sshll.u32 %s284_s1, 4  ;;  %s2153_s11 = scalar_lea.sflag [#allocation10], %s233_s28  ;;  %s296_s24 = int_to_ptr.vmem [resolvable:$true] %s295_s24 }
  0x22   : > { %s2159_s13 = sadd.s32 4294967295, %s2030_s23   ;;  %s1634_s16 = sadd.s32 4294967294, %s2030_s23  }
  0x23   : > { %s2146_s8 = scalar_lea.hbm %s2615_s2, %s1690_s27  ;;  %p85_p8 = scmp.ne.s32.totalorder %s2014_s19, %s2010_s18 }
  0x24   : > { %s291_s12 = scalar_lea.hbm %s2616_s3, %s1690_s27  ;;  %p86_p9 = scmp.eq.s32.totalorder %s2159_s13, 0 }
  0x25   : > { %s293_s6 = sshll.u32 %s291_s12, 4  ;;  %p191_p10 = scmp.eq.s32.totalorder %s2159_s13, 1  ;;  %s294_s6 = int_to_ptr.hbm [resolvable:$true] %s293_s6 }
  0x26   : > { %1720 = dma.hbm_to_vmem [thread:$0]  (!%p2132_p7), %s294_s6, 64, %s296_s24, %s2153_s11  }
  0x27   : > { %p197_p11 = scmp.eq.s32.totalorder %s1634_s16, 1  ;;  %p1635_p12 = scmp.ge.s32.totalorder %s2030_s23, 1 }
  0x28   : > { %p2169_p13 = por %p86_p9, %p85_p8  ;;  %p2176_p0 = por %p191_p10, %p79_p1 }
  0x29   : > { %p2180_p2 = por %p197_p11, %p85_p8  ;;  %p204_p4 = scmp.lt.s32.totalorder %s2030_s23, 3 }
  0x2a   : > { %s2620_s0 = sld [smem:[#allocation21_spill]]  ;;  %s2035_s30 = smov [#allocation3]  }
  0x2b   : > { %p2188_p5 = pnand %p1635_p12, %p204_p4  ;;  %s219_s7 = sshll.u32 %s2035_s30, 4  ;;  %s220_s7 = int_to_ptr.vmem [resolvable:$true] %s219_s7 }
  0x2c   : > { %s271_s9 = sshll.u32 %s2146_s8, 4  ;;  %s262_s10 = scalar_lea.vmem [#allocation8], %s1641_s26  ;;  %s272_s9 = int_to_ptr.hbm [resolvable:$true] %s271_s9 }
  0x2d   : > { %p1707_p1 = pneg %p2188_p5  ;;  %s273_s12 = sshll.u32 %s262_s10, 4  ;;  %s274_s12 = int_to_ptr.vmem [resolvable:$true] %s273_s12 }
  0x2e   : > { %s2036_s16 = smov 64   ;;  %s2037_s6 = smov 4  }
  0x2f   : > { %p1708_p6 = pnand %p1707_p1, %p86_p9  ;;  %s1647_s17 = sshll.u32 %s2118_s29, 1 }
  0x30   : > { %s217_s25 = sshll.u32 %s2620_s0, 4  ;;  %s1648_s0 = sshll.u32 %s2026_s22, 1  ;;  %s218_s25 = int_to_ptr.hbm [resolvable:$true] %s217_s25 }
  0x31   : > { %1710 = dma.hbm_to_vmem [thread:$0]  (!%p1708_p6), %s218_s25, 512, %s220_s7, [#allocation4], %s2036_s16, %s2036_s16, %s2037_s6  }
  0x32   : > { %1717 = dma.hbm_to_vmem [thread:$0]  (!%p2132_p7), %s272_s9, 64, %s274_s12, %s2136_s15  }
  0x33   : > { %s310_s3 = scalar_lea.hbm %s2598_s4, %s1648_s0  ;;  %s306_s8 = scalar_lea.vmem [#allocation11], %s1647_s17 }
  0x34   : > { %s312_s20 = sshll.u32 %s310_s3, 4  ;;  %s314_s23 = sshll.u32 %s306_s8, 4  ;;  %s313_s20 = int_to_ptr.hbm [resolvable:$true] %s312_s20  ;;  %s315_s23 = int_to_ptr.vmem [resolvable:$true] %s314_s23 }
  0x35   : > { %1723 = dma.hbm_to_vmem [thread:$0]  (!%p2132_p7), %s313_s20, 32, %s315_s23, %s2153_s11  }
  0x36   : > { %323 = sbr.rel (%p2188_p5) target bundleno = 380 (0x17c), region = 40 }
  0x3b   : > { %1993 = dma.done.wait (%p86_p9), [#allocation4], 512  }
  0x3c   : > { %1995 = vsyncadd (%p86_p9), [#allocation4], 4294966784  ;;  %s330_s0 = sand.u32 1, %s2159_s13   ;;  %s2218_s2 = sand.u32 1, %s2014_s19  }
  0x3d   : > { %s1651_s3 = sshll.u32 %s2218_s2, 6  ;;  %s331_s29 = scalar_lea.sflag [#allocation7], %s330_s0 }
  0x3e   : > { %s2221_s14 = scalar_lea.vmem [#allocation6], %s1651_s3 }
  0x3f   : > { %1997 = dma.done.wait (%p2169_p13), %s331_s29, 1088  }
  0x40   : > { %1999 = vsyncadd (%p2169_p13), %s331_s29, 4294966208  ;;  %s1652_s20 = sshll.u32 %s2218_s2, 2  ;;  %s351_s15 = scalar_lea.sflag [#allocation10], %s330_s0 }
  0x41   : > { %s344_s23 = scalar_lea.vmem [#allocation8], %s1652_s20  ;;  %s354_s26 = scalar_lea.vmem [#allocation9], %s1652_s20 }
  0x42   : > { %2001 = dma.done.wait (%p2169_p13), %s351_s15, 96  }
  0x43   : > { %2003 = vsyncadd (%p2169_p13), %s351_s15, 4294967200  ;;  %v2233_v0 = vld [vmem:[%s2221_s14 + $0x20] sm:$0xff]  ;;  %vm444_vm0 = vcmask 1041409   ;;  %vm446_vm1 = vcmask 1043459   ;;  %vm448_vm2 = vcmask 1042433   ;;  %v2241_v4 = vld [vmem:[%s2221_s14 + $0x28] sm:$0xff] }
  0x44   : > { %v2235_v1 = vld [vmem:[%s344_s23] sm:$0xf]  ;;  %v2237_v2 = vld [vmem:[%s354_s26] sm:$0xf]  ;;  %v620_v3 = vand.u32 15, %v2233_v0  ;;  %v2244_v5 = vld [vmem:[%s2221_s14 + $0x30] sm:$0xff] }
  0x45   : > { %v430_v6 = vrot.slane %v2235_v1, 1  ;;  %v431_v7 = vrot.slane %v2235_v1, 2  ;;  %v432_v8 = vrot.slane %v2235_v1, 3  ;;  %v526_v9 = vrot.slane %v2237_v2, 1  ;;  %v2251_v10 = vld [vmem:[%s2221_s14 + $0x38] sm:$0xff]  ;;  %s1654_s11 = sshll.u32 %s2218_s2, 1 }
  0x46   : > { %v527_v11 = vrot.slane %v2237_v2, 2  ;;  %v528_v12 = vrot.slane %v2237_v2, 3  ;;  %v621_v13 = vand.u32 15, %v2241_v4  ;;  %v622_v14 = vand.u32 15, %v2244_v5  ;;  %s364_s13 = scalar_lea.vmem [#allocation11], %s1654_s11  ;;  %s1655_s1 = sshll.u32 %s2218_s2, 3 }
  0x47   : > { %v445_v15 = vsel %vm444_vm0, %v2235_v1, %v430_v6  ;;  %v447_v16 = vsel %vm446_vm1, %v431_v7, %v432_v8  ;;  %v537_v17 = vsel %vm444_vm0, %v2237_v2, %v526_v9  ;;  %v623_v18 = vand.u32 15, %v2251_v10  ;;  %s1692_s25 = sshll.u32 %s2022_s21, 3  ;;  %s406_s10 = scalar_lea.vmem [#allocation12], %s1655_s1 }
  0x48   : > { %v449_v19 = vsel %vm448_vm2, %v445_v15, %v447_v16  ;;  %v538_v20 = vsel %vm446_vm1, %v527_v11, %v528_v12  ;;  %v628_v21 = vcvt.s32.f32 %v620_v3  ;;  %v629_v22 = vcvt.s32.f32 %v621_v13  ;;  %s1464_s9 = scalar_lea.hbm %s2599_s5, %s1692_s25  ;;  %s1466_s21 = sshll.u32 %s406_s10, 4  ;;  %s1467_s21 = int_to_ptr.vmem [resolvable:$true] %s1466_s21 }
  0x49   : > { %v451_v23 = vrot.slane %v449_v19, 1  ;;  %v539_v24 = vsel %vm448_vm2, %v537_v17, %v538_v20  ;;  %v630_v25 = vcvt.s32.f32 %v622_v14  ;;  %v631_v26 = vcvt.s32.f32 %v623_v18  ;;  %s1468_s12 = sshll.u32 %s1464_s9, 4  ;;  %s1453_s16 = scalar_lea.sflag [#allocation5], %s2218_s2  ;;  %s1469_s12 = int_to_ptr.hbm [resolvable:$true] %s1468_s12 }
  0x4a   : > { %v541_v27 = vrot.slane %v539_v24, 1  ;;  %v2278_v28 = vpack.c.bf16 %v629_v22, %v628_v21  ;;  %v729_v29 = vshra.s32 %v2233_v0, 4  ;;  %v730_v30 = vshra.s32 %v2241_v4, 4  ;;  %s1954_s6 = sshra.s32 %s1469_s12, 4  ;;  %s1960_s0 = scalar_lea.hbm %s2599_s5, 16  ;;  %s1955_s6 = int_to_ptr.hbm [resolvable:$true] %s1954_s6 }
  0x4b   : > { %v455_v31 = vunpack.i.h.s16 %v451_v23  ;;  %v1657_v32 = vpack.i.b16 %v451_v23, %v451_v23  ;;  %v2282_v33 = vpack.c.bf16 %v631_v26, %v630_v25  ;;  %v731_v34 = vshra.s32 %v2244_v5, 4  ;;  %s1956_s17 = scalar_lea.hbm %s1955_s6, 8  ;;  %p1961_p10 = scmp.lt.s32.totalorder %s1955_s6, %s2599_s5 }
  0x4c   : > { %v545_v35 = vunpack.i.h.s16 %v541_v27  ;;  %v1659_v36 = vpack.i.b16 %v541_v27, %v541_v27  ;;  %v640_v37 = vunpack.c.l.bf16 %v2278_v28  ;;  %v641_v38 = vunpack.c.h.bf16 %v2278_v28  ;;  %p1957_p7 = scmp.ne.s32.totalorder %s1955_s6, %s1956_s17  ;;  %p1962_p11 = scmp.lt.s32.totalorder %s1960_s0, %s1956_s17 }
  0x4d   : > { %v459_v39 = vpack.i.b16 %v455_v31, %v455_v31  ;;  %v464_v40 = vperm.slane %v1657_v32, 0  ;;  %v465_v41 = vperm.slane %v1657_v32, 1  ;;  %v642_v42 = vunpack.c.l.bf16 %v2282_v33 }
  0x4e   : > { %v549_v43 = vpack.i.b16 %v545_v35, %v545_v35  ;;  %v554_v44 = vperm.slane %v1659_v36, 0  ;;  %v555_v45 = vperm.slane %v1659_v36, 1  ;;  %v643_v46 = vunpack.c.h.bf16 %v2282_v33  ;;  %p1958_p8 = pnand %p1957_p7, %p2176_p0  ;;  %p1963_p12 = por %p1962_p11, %p1961_p10 }
  0x4f   : > { %v466_v47 = vperm.slane %v459_v39, 0  ;;  %v467_v48 = vperm.slane %v459_v39, 1  ;;  %v485_v49 = vpack.i.b16 %v464_v40, %v464_v40  ;;  %v489_v50 = vpack.i.b16 %v465_v41, %v465_v41 }
  0x50   : > { %v556_v51 = vperm.slane %v549_v43, 0  ;;  %v557_v52 = vperm.slane %v549_v43, 1  ;;  %v575_v53 = vpack.i.b16 %v554_v44, %v554_v44  ;;  %v579_v54 = vpack.i.b16 %v555_v45, %v555_v45  ;;  %p1959_p9 = pneg %p1958_p8 }
  0x51   : > { %v487_v55 = vperm.slane %v485_v49, 0  ;;  %v491_v56 = vperm.slane %v489_v50, 0  ;;  %v493_v57 = vpack.i.b16 %v466_v47, %v466_v47  ;;  %v497_v58 = vpack.i.b16 %v467_v48, %v467_v48 }
  0x52   : > { %v577_v59 = vperm.slane %v575_v53, 0  ;;  %v581_v60 = vperm.slane %v579_v54, 0  ;;  %v583_v61 = vpack.i.b16 %v556_v51, %v556_v51  ;;  %v587_v62 = vpack.i.b16 %v557_v52, %v557_v52  ;;  %p1964_p13 = pnand %p1963_p12, %p1959_p9 }
  0x53   : > { %vm433_vm3 = vcmask 1040384   ;;  %v495_v63 = vperm.slane %v493_v57, 0  ;;  %v499_v3 = vperm.slane %v497_v58, 0  ;;  %v512_v13 = vunpack.c.l.b16 %v487_v55 }
  0x54   : > { %v513_v14 = vunpack.c.l.b16 %v491_v56  ;;  %vm437_vm4 = vcmask 1042434   ;;  %v585_v15 = vperm.slane %v583_v61, 0  ;;  %v589_v16 = vperm.slane %v587_v62, 0 }
  0x55   : > { %v602_v17 = vunpack.c.l.b16 %v577_v59  ;;  %v603_v18 = vunpack.c.l.b16 %v581_v60  ;;  %vm441_vm5 = vcmask 1041408   ;;  %v514_v19 = vunpack.c.l.b16 %v495_v63 }
  0x56   : > { %v515_v20 = vunpack.c.l.b16 %v499_v3  ;;  %v518_v21 = vpack.c.b16 %v513_v14, %v512_v13  ;;  %v732_v22 = vshra.s32 %v2251_v10, 4  ;;  %v604_v23 = vunpack.c.l.b16 %v585_v15 }
  0x57   : > { %v605_v24 = vunpack.c.l.b16 %v589_v16  ;;  %v608_v25 = vpack.c.b16 %v603_v18, %v602_v17  ;;  %v737_v26 = vand.u32 15, %v729_v29  ;;  %v738_v32 = vand.u32 15, %v730_v30  ;;  %v2333_v16 = vld [vmem:[%s2221_s14] sm:$0xff] }
  0x58   : > { %v519_v27 = vpack.c.b16 %v515_v20, %v514_v19  ;;  %v2290_v28 = vunpack.c.l.bf16 %v518_v21  ;;  %v2292_v31 = vunpack.c.h.bf16 %v518_v21  ;;  %v739_v39 = vand.u32 15, %v731_v34 }
  0x59   : > { %v609_v33 = vpack.c.b16 %v605_v24, %v604_v23  ;;  %v2294_v35 = vunpack.c.l.bf16 %v608_v25  ;;  %v2296_v36 = vunpack.c.h.bf16 %v608_v25  ;;  %v740_v43 = vand.u32 15, %v732_v22 }
  0x5a   : > { %v2298_v40 = vunpack.c.l.bf16 %v519_v27  ;;  %v2300_v41 = vunpack.c.h.bf16 %v519_v27  ;;  %v745_v44 = vcvt.s32.f32 %v737_v26  ;;  %v746_v48 = vcvt.s32.f32 %v738_v32 }
  0x5b   : > { %v2302_v45 = vunpack.c.l.bf16 %v609_v33  ;;  %v2304_v29 = vunpack.c.h.bf16 %v609_v33  ;;  %v656_v47 = vsub.f32 %v640_v37, %v2294_v35  ;;  %v657_v30 = vsub.f32 %v641_v38, %v2296_v36 }
  0x5c   : > { %v747_v49 = vcvt.s32.f32 %v739_v39  ;;  %v748_v50 = vcvt.s32.f32 %v740_v43  ;;  %v436_v34 = vsel %vm433_vm3, %v2235_v1, %v430_v6  ;;  %v440_v37 = vsel %vm437_vm4, %v431_v7, %v432_v8 }
  0x5d   : > { %v658_v51 = vsub.f32 %v642_v42, %v2302_v45  ;;  %v659_v52 = vsub.f32 %v643_v46, %v2304_v29  ;;  %v662_v53 = vpack.c.bf16 %v657_v30, %v656_v47  ;;  %v751_v38 = vpack.c.bf16 %v746_v48, %v745_v44 }
  0x5e   : > { %v752_v54 = vpack.c.bf16 %v748_v50, %v747_v49  ;;  %v442_v55 = vsel %vm441_vm5, %v436_v34, %v440_v37  ;;  %v531_v6 = vsel %vm433_vm3, %v2237_v2, %v526_v9  ;;  %v534_v21 = vsel %vm437_vm4, %v527_v11, %v528_v12  ;;  %v2346_v49 = vld [vmem:[%s2221_s14 + $0x8] sm:$0xff] }
  0x5f   : > { %v663_v56 = vpack.c.bf16 %v659_v52, %v658_v51  ;;  %v668_v42 = vunpack.c.l.bf16 %v662_v53  ;;  %v669_v57 = vunpack.c.h.bf16 %v662_v53  ;;  %v453_v46 = vunpack.i.h.s16 %v442_v55 }
  0x60   : > { %v757_v58 = vunpack.c.l.bf16 %v751_v38  ;;  %v758_v59 = vunpack.c.h.bf16 %v751_v38  ;;  %v759_v60 = vunpack.c.l.bf16 %v752_v54  ;;  %v760_v1 = vunpack.c.h.bf16 %v752_v54 }
  0x61   : > { %v670_v61 = vunpack.c.l.bf16 %v663_v56  ;;  %v684_v7 = vmul.f32 %v2290_v28, %v668_v42  ;;  %v671_v8 = vunpack.c.h.bf16 %v663_v56  ;;  %v685_v62 = vmul.f32 %v2292_v31, %v669_v57  ;;  %v2354_v56 = vld [vmem:[%s2221_s14 + $0x18] sm:$0xff] }
  0x62   : > { %v765_v63 = vsub.f32 %v757_v58, %v2294_v35  ;;  %v766_v3 = vsub.f32 %v758_v59, %v2296_v36  ;;  %v767_v9 = vsub.f32 %v759_v60, %v2302_v45  ;;  %v768_v13 = vsub.f32 %v760_v1, %v2304_v29 }
  0x63   : > { %v686_v14 = vmul.f32 %v2298_v40, %v670_v61  ;;  %v687_v15 = vmul.f32 %v2300_v41, %v671_v8  ;;  %v1656_v17 = vpack.i.b16 %v442_v55, %v442_v55  ;;  %v457_v18 = vpack.i.b16 %v453_v46, %v453_v46  ;;  %v2351_v55 = vld [vmem:[%s2221_s14 + $0x10] sm:$0xff] }
  0x64   : > { %v771_v19 = vpack.c.bf16 %v766_v3, %v765_v63  ;;  %v772_v20 = vpack.c.bf16 %v768_v13, %v767_v9  ;;  %v616_v22 = vand.u32 15, %v2333_v16  ;;  %v535_v38 = vsel %vm441_vm5, %v531_v6, %v534_v21 }
  0x65   : > { %v690_v23 = vpack.c.bf16 %v686_v14, %v684_v7  ;;  %v691_v24 = vpack.c.bf16 %v687_v15, %v685_v62  ;;  %v460_v25 = vperm.slane %v1656_v17, 0  ;;  %v461_v26 = vperm.slane %v1656_v17, 1 }
  0x66   : > { %v777_v27 = vunpack.c.l.bf16 %v771_v19  ;;  %v779_v32 = vunpack.c.l.bf16 %v772_v20  ;;  %v778_v33 = vunpack.c.h.bf16 %v771_v19  ;;  %v780_v39 = vunpack.c.h.bf16 %v772_v20 }
  0x67   : > { %703 = vmatpush.bf16.msra.mxu0 %v690_v23  ;;  %716 = vmatpush.bf16.msra.mxu1 %v691_v24  ;;  %v462_v43 = vperm.slane %v457_v18, 0  ;;  %v463_v44 = vperm.slane %v457_v18, 1  ;;  %v469_v47 = vpack.i.b16 %v460_v25, %v460_v25  ;;  %v473_v2 = vpack.i.b16 %v461_v26, %v461_v26 }
  0x68   : > { %v785_v11 = vmul.f32 %v777_v27, %v2290_v28  ;;  %v787_v12 = vmul.f32 %v779_v32, %v2298_v40  ;;  %v786_v30 = vmul.f32 %v778_v33, %v2292_v31  ;;  %v788_v48 = vmul.f32 %v780_v39, %v2300_v41 }
  0x69   : > { %v471_v50 = vperm.slane %v469_v47, 0  ;;  %v475_v34 = vperm.slane %v473_v2, 0  ;;  %v477_v51 = vpack.i.b16 %v462_v43, %v462_v43  ;;  %v481_v52 = vpack.i.b16 %v463_v44, %v463_v44 }
  0x6a   : > { %v791_v53 = vpack.c.bf16 %v787_v12, %v785_v11  ;;  %v792_v37 = vpack.c.bf16 %v788_v48, %v786_v30  ;;  %v617_v54 = vand.u32 15, %v2346_v49  ;;  %v543_v59 = vunpack.i.h.s16 %v535_v38 }
  0x6b   : > { %v479_v42 = vperm.slane %v477_v51, 0  ;;  %v483_v57 = vperm.slane %v481_v52, 0  ;;  %v508_v46 = vunpack.c.l.b16 %v471_v50  ;;  %v509_v58 = vunpack.c.l.b16 %v475_v34 }
  0x6c   : > { %804 = vmatpush.bf16.msra.mxu2 %v791_v53  ;;  %817 = vmatpush.bf16.msra.mxu3 %v792_v37  ;;  %v1658_v60 = vpack.i.b16 %v535_v38, %v535_v38  ;;  %v618_v1 = vand.u32 15, %v2351_v55  ;;  %v619_v61 = vand.u32 15, %v2354_v56  ;;  %v624_v62 = vcvt.s32.f32 %v616_v22 }
  0x6d   : > { %v510_v7 = vunpack.c.l.b16 %v479_v42  ;;  %v511_v6 = vunpack.c.l.b16 %v483_v57  ;;  %v516_v8 = vpack.c.b16 %v509_v58, %v508_v46  ;;  %v547_v63 = vpack.i.b16 %v543_v59, %v543_v59 }
  0x6e   : > { %v550_v3 = vperm.slane %v1658_v60, 0  ;;  %v551_v9 = vperm.slane %v1658_v60, 1  ;;  %v625_v13 = vcvt.s32.f32 %v617_v54  ;;  %v626_v15 = vcvt.s32.f32 %v618_v1 }
  0x6f   : > { %v517_v14 = vpack.c.b16 %v511_v6, %v510_v7  ;;  %v627_v17 = vcvt.s32.f32 %v619_v61  ;;  %v552_v18 = vperm.slane %v547_v63, 0  ;;  %v553_v19 = vperm.slane %v547_v63, 1 }
  0x70   : > { %v559_v20 = vpack.i.b16 %v550_v3, %v550_v3  ;;  %v563_v21 = vpack.i.b16 %v551_v9, %v551_v9  ;;  %v632_v23 = vpack.c.bf16 %v625_v13, %v624_v62  ;;  %v2358_v25 = vunpack.c.l.bf16 %v516_v8 }
  0x71   : > { %v633_v24 = vpack.c.bf16 %v627_v17, %v626_v15  ;;  %v2360_v26 = vunpack.c.l.bf16 %v517_v14  ;;  %v567_v22 = vpack.i.b16 %v552_v18, %v552_v18  ;;  %v571_v33 = vpack.i.b16 %v553_v19, %v553_v19 }
  0x72   : > { %v561_v27 = vperm.slane %v559_v20, 0  ;;  %v565_v32 = vperm.slane %v563_v21, 0  ;;  %v636_v39 = vunpack.c.l.bf16 %v632_v23  ;;  %v637_v43 = vunpack.c.h.bf16 %v632_v23 }
  0x73   : > { %v638_v44 = vunpack.c.l.bf16 %v633_v24  ;;  %v2362_v47 = vunpack.c.h.bf16 %v516_v8  ;;  %v569_v2 = vperm.slane %v567_v22, 0  ;;  %v573_v11 = vperm.slane %v571_v33, 0 }
  0x74   : > { %v598_v12 = vunpack.c.l.b16 %v561_v27  ;;  %v599_v30 = vunpack.c.l.b16 %v565_v32  ;;  %v639_v48 = vunpack.c.h.bf16 %v633_v24  ;;  %v725_v50 = vshra.s32 %v2333_v16, 4 }
  0x75   : > { %v726_v34 = vshra.s32 %v2346_v49, 4  ;;  %v727_v51 = vshra.s32 %v2351_v55, 4  ;;  %v600_v52 = vunpack.c.l.b16 %v569_v2  ;;  %v601_v53 = vunpack.c.l.b16 %v573_v11 }
  0x76   : > { %v606_v37 = vpack.c.b16 %v599_v30, %v598_v12  ;;  %v728_v38 = vshra.s32 %v2354_v56, 4  ;;  %v2368_v54 = vunpack.c.h.bf16 %v517_v14  ;;  %v733_v42 = vand.u32 15, %v725_v50 }
  0x77   : > { %v734_v57 = vand.u32 15, %v726_v34  ;;  %v735_v46 = vand.u32 15, %v727_v51  ;;  %v607_v58 = vpack.c.b16 %v601_v53, %v600_v52  ;;  %v931_v8 = vshra.s32 %v2233_v0, 12 }
  0x78   : > { %v2370_v59 = vunpack.c.l.bf16 %v606_v37  ;;  %v2372_v60 = vunpack.c.h.bf16 %v606_v37  ;;  %v736_v1 = vand.u32 15, %v728_v38  ;;  %v741_v61 = vcvt.s32.f32 %v733_v42 }
  0x79   : > { %v742_v7 = vcvt.s32.f32 %v734_v57  ;;  %v743_v6 = vcvt.s32.f32 %v735_v46  ;;  %v2375_v62 = vunpack.c.l.bf16 %v607_v58  ;;  %v2377_v63 = vunpack.c.h.bf16 %v607_v58 }
  0x7a   : > { %v652_v3 = vsub.f32 %v636_v39, %v2370_v59  ;;  %v653_v9 = vsub.f32 %v637_v43, %v2372_v60  ;;  %v744_v13 = vcvt.s32.f32 %v736_v1  ;;  %v932_v15 = vshra.s32 %v2241_v4, 12 }
  0x7b   : > { %v749_v14 = vpack.c.bf16 %v742_v7, %v741_v61  ;;  %v933_v17 = vshra.s32 %v2244_v5, 12  ;;  %v654_v18 = vsub.f32 %v638_v44, %v2375_v62  ;;  %v655_v19 = vsub.f32 %v639_v48, %v2377_v63 }
  0x7c   : > { %v660_v20 = vpack.c.bf16 %v653_v9, %v652_v3  ;;  %v934_v21 = vshra.s32 %v2251_v10, 12  ;;  %v750_v23 = vpack.c.bf16 %v744_v13, %v743_v6  ;;  %v939_v32 = vand.u32 15, %v931_v8 }
  0x7d   : > { %v753_v24 = vunpack.c.l.bf16 %v749_v14  ;;  %v754_v27 = vunpack.c.h.bf16 %v749_v14  ;;  %v661_v22 = vpack.c.bf16 %v655_v19, %v654_v18  ;;  %vm693_vm6 = vcmask 261120   ;;  %v692_v18 = vld [vmem:[#allocation3] sm:$0xf] }
  0x7e   : > { %v664_v33 = vunpack.c.l.bf16 %v660_v20  ;;  %v665_v39 = vunpack.c.h.bf16 %v660_v20  ;;  %v940_v43 = vand.u32 15, %v932_v15  ;;  %v755_v2 = vunpack.c.l.bf16 %v750_v23 }
  0x7f   : > { %v756_v11 = vunpack.c.h.bf16 %v750_v23  ;;  %v761_v12 = vsub.f32 %v753_v24, %v2370_v59  ;;  %v762_v44 = vsub.f32 %v754_v27, %v2372_v60  ;;  %v666_v30 = vunpack.c.l.bf16 %v661_v22 }
  0x80   : > { %v680_v48 = vmul.f32 %v2358_v25, %v664_v33  ;;  %v667_v50 = vunpack.c.h.bf16 %v661_v22  ;;  %v681_v34 = vmul.f32 %v2362_v47, %v665_v39  ;;  %v763_v51 = vsub.f32 %v755_v2, %v2375_v62 }
  0x81   : > { %v764_v52 = vsub.f32 %v756_v11, %v2377_v63  ;;  %v769_v53 = vpack.c.bf16 %v762_v44, %v761_v12  ;;  %v941_v37 = vand.u32 15, %v933_v17  ;;  %v682_v38 = vmul.f32 %v2360_v26, %v666_v30 }
  0x82   : > { %v683_v42 = vmul.f32 %v2368_v54, %v667_v50  ;;  %v942_v57 = vand.u32 15, %v934_v21  ;;  %v947_v46 = vcvt.s32.f32 %v939_v32  ;;  %v948_v7 = vcvt.s32.f32 %v940_v43 }
  0x83   : > { %v770_v58 = vpack.c.bf16 %v764_v52, %v763_v51  ;;  %v773_v1 = vunpack.c.l.bf16 %v769_v53  ;;  %v774_v61 = vunpack.c.h.bf16 %v769_v53  ;;  %v688_v6 = vpack.c.bf16 %v682_v38, %v680_v48  ;;  %v794_v52 = vld [vmem:[#allocation3 + $0x4] sm:$0xf] }
  0x84   : > { %v689_v8 = vpack.c.bf16 %v683_v42, %v681_v34  ;;  %v949_v3 = vcvt.s32.f32 %v941_v37  ;;  %v950_v9 = vcvt.s32.f32 %v942_v57  ;;  %v953_v19 = vpack.c.bf16 %v948_v7, %v947_v46 }
  0x85   : > { %v775_v13 = vunpack.c.l.bf16 %v770_v58  ;;  %v781_v14 = vmul.f32 %v773_v1, %v2358_v25  ;;  %v776_v15 = vunpack.c.h.bf16 %v770_v58  ;;  %v782_v17 = vmul.f32 %v774_v61, %v2362_v47  ;;  %704 = vmatpush.bf16.msra.mxu0 %v688_v6 }
  0x86   : > { %717 = vmatpush.bf16.msra.mxu1 %v689_v8  ;;  %v954_v20 = vpack.c.bf16 %v950_v9, %v949_v3  ;;  %v830_v21 = vshra.s32 %v2233_v0, 8  ;;  %v831_v23 = vshra.s32 %v2241_v4, 8  ;;  %v832_v32 = vshra.s32 %v2244_v5, 8 }
  0x87   : > { %v783_v24 = vmul.f32 %v775_v13, %v2360_v26  ;;  %v784_v27 = vmul.f32 %v776_v15, %v2368_v54  ;;  %v833_v22 = vshra.s32 %v2251_v10, 8  ;;  %v959_v33 = vunpack.c.l.bf16 %v953_v19 }
  0x88   : > { %v960_v39 = vunpack.c.h.bf16 %v953_v19  ;;  %v961_v43 = vunpack.c.l.bf16 %v954_v20  ;;  %v962_v2 = vunpack.c.h.bf16 %v954_v20  ;;  %1660 = vmatmul.msk.bf16.vlgmr.msra.gmra.mxu0 %vm693_vm6, %v692_v18  ;;  %v838_v44 = vand.u32 15, %v830_v21 }
  0x89   : > { %v789_v11 = vpack.c.bf16 %v783_v24, %v781_v14  ;;  %v790_v12 = vpack.c.bf16 %v784_v27, %v782_v17  ;;  %1661 = vmatmul.msk.bf16.vlgmr.msra.gmra.mxu1 %vm693_vm6, %v692_v18  ;;  %v839_v30 = vand.u32 15, %v831_v23  ;;  %v967_v48 = vsub.f32 %v959_v33, %v2294_v35 }
  0x8a   : > { %v968_v50 = vsub.f32 %v960_v39, %v2296_v36  ;;  %v969_v34 = vsub.f32 %v961_v43, %v2302_v45  ;;  %v970_v51 = vsub.f32 %v962_v2, %v2304_v29  ;;  %v840_v53 = vand.u32 15, %v832_v32 }
  0x8b   : > { %805 = vmatpush.bf16.msra.mxu2 %v789_v11  ;;  %818 = vmatpush.bf16.msra.mxu3 %v790_v12  ;;  %v841_v37 = vand.u32 15, %v833_v22  ;;  %v846_v38 = vcvt.s32.f32 %v838_v44  ;;  %v847_v42 = vcvt.s32.f32 %v839_v30  ;;  %v927_v58 = vshra.s32 %v2333_v16, 12 }
  0x8c   : > { %v973_v57 = vpack.c.bf16 %v968_v50, %v967_v48  ;;  %v974_v46 = vpack.c.bf16 %v970_v51, %v969_v34  ;;  %v928_v1 = vshra.s32 %v2346_v49, 12  ;;  %v848_v61 = vcvt.s32.f32 %v840_v53 }
  0x8d   : > { %v849_v7 = vcvt.s32.f32 %v841_v37  ;;  %v852_v6 = vpack.c.bf16 %v847_v42, %v846_v38  ;;  %v929_v8 = vshra.s32 %v2351_v55, 12  ;;  %v930_v19 = vshra.s32 %v2354_v56, 12 }
  0x8e   : > { %1662 = vmatmul.msk.bf16.vlgmr.msra.gmra.mxu2 %vm693_vm6, %v794_v52  ;;  %1663 = vmatmul.msk.bf16.vlgmr.msra.gmra.mxu3 %vm693_vm6, %v794_v52  ;;  %v979_v3 = vunpack.c.l.bf16 %v973_v57  ;;  %v981_v9 = vunpack.c.l.bf16 %v974_v46  ;;  %v980_v13 = vunpack.c.h.bf16 %v973_v57  ;;  %v982_v14 = vunpack.c.h.bf16 %v974_v46 }
  0x8f   : > { %v853_v15 = vpack.c.bf16 %v849_v7, %v848_v61  ;;  %v858_v17 = vunpack.c.l.bf16 %v852_v6  ;;  %v859_v18 = vunpack.c.h.bf16 %v852_v6  ;;  %v935_v2 = vand.u32 15, %v927_v58 }
  0x90   : > { %v987_v20 = vmul.f32 %v979_v3, %v2290_v28  ;;  %v989_v21 = vmul.f32 %v981_v9, %v2298_v40  ;;  %v988_v23 = vmul.f32 %v980_v13, %v2292_v31  ;;  %v990_v24 = vmul.f32 %v982_v14, %v2300_v41 }
  0x91   : > { %v860_v27 = vunpack.c.l.bf16 %v853_v15  ;;  %v861_v32 = vunpack.c.h.bf16 %v853_v15  ;;  %v866_v22 = vsub.f32 %v858_v17, %v2294_v35  ;;  %v867_v33 = vsub.f32 %v859_v18, %v2296_v36 }
  0x92   : > { %v993_v39 = vpack.c.bf16 %v989_v21, %v987_v20  ;;  %v994_v43 = vpack.c.bf16 %v990_v24, %v988_v23  ;;  %v936_v11 = vand.u32 15, %v928_v1  ;;  %v937_v48 = vand.u32 15, %v929_v8 }
  0x93   : > { %v868_v12 = vsub.f32 %v860_v27, %v2302_v45  ;;  %v869_v44 = vsub.f32 %v861_v32, %v2304_v29  ;;  %v872_v30 = vpack.c.bf16 %v867_v33, %v866_v22  ;;  %v938_v50 = vand.u32 15, %v930_v19 }
  0x94   : > { %1006 = vmatpush.bf16.msrb.mxu2 %v993_v39  ;;  %1019 = vmatpush.bf16.msrb.mxu3 %v994_v43  ;;  %v943_v34 = vcvt.s32.f32 %v935_v2  ;;  %v944_v51 = vcvt.s32.f32 %v936_v11  ;;  %v826_v52 = vshra.s32 %v2333_v16, 8  ;;  %v945_v42 = vcvt.s32.f32 %v937_v48 }
  0x95   : > { %v873_v53 = vpack.c.bf16 %v869_v44, %v868_v12  ;;  %v878_v37 = vunpack.c.l.bf16 %v872_v30  ;;  %v879_v38 = vunpack.c.h.bf16 %v872_v30  ;;  %v946_v57 = vcvt.s32.f32 %v938_v50 }
  0x96   : > { %v951_v46 = vpack.c.bf16 %v944_v51, %v943_v34  ;;  %v827_v58 = vshra.s32 %v2346_v49, 8  ;;  %v828_v1 = vshra.s32 %v2351_v55, 8  ;;  %v829_v14 = vshra.s32 %v2354_v56, 8 }
  0x97   : > { %v880_v61 = vunpack.c.l.bf16 %v873_v53  ;;  %v886_v7 = vmul.f32 %v878_v37, %v2290_v28  ;;  %v881_v6 = vunpack.c.h.bf16 %v873_v53  ;;  %v887_v8 = vmul.f32 %v879_v38, %v2292_v31 }
  0x98   : > { %v952_v3 = vpack.c.bf16 %v946_v57, %v945_v42  ;;  %v955_v9 = vunpack.c.l.bf16 %v951_v46  ;;  %v956_v13 = vunpack.c.h.bf16 %v951_v46  ;;  %v834_v18 = vand.u32 15, %v826_v52 }
  0x99   : > { %v888_v15 = vmul.f32 %v880_v61, %v2298_v40  ;;  %v889_v17 = vmul.f32 %v881_v6, %v2300_v41  ;;  %v835_v19 = vand.u32 15, %v827_v58  ;;  %v836_v22 = vand.u32 15, %v828_v1 }
  0x9a   : > { %v957_v20 = vunpack.c.l.bf16 %v952_v3  ;;  %v958_v21 = vunpack.c.h.bf16 %v952_v3  ;;  %v963_v23 = vsub.f32 %v955_v9, %v2370_v59  ;;  %v964_v24 = vsub.f32 %v956_v13, %v2372_v60 }
  0x9b   : > { %v892_v27 = vpack.c.bf16 %v888_v15, %v886_v7  ;;  %v893_v32 = vpack.c.bf16 %v889_v17, %v887_v8  ;;  %v837_v33 = vand.u32 15, %v829_v14  ;;  %v842_v11 = vcvt.s32.f32 %v834_v18 }
  0x9c   : > { %v965_v39 = vsub.f32 %v957_v20, %v2375_v62  ;;  %v966_v43 = vsub.f32 %v958_v21, %v2377_v63  ;;  %v971_v2 = vpack.c.bf16 %v964_v24, %v963_v23  ;;  %v843_v12 = vcvt.s32.f32 %v835_v19 }
  0x9d   : > { %905 = vmatpush.bf16.msrb.mxu0 %v892_v27  ;;  %918 = vmatpush.bf16.msrb.mxu1 %v893_v32  ;;  %v844_v44 = vcvt.s32.f32 %v836_v22  ;;  %v845_v30 = vcvt.s32.f32 %v837_v33  ;;  %v1133_v48 = vshra.s32 %v2233_v0, 20  ;;  %v1134_v52 = vshra.s32 %v2241_v4, 20 }
  0x9e   : > { %v972_v50 = vpack.c.bf16 %v966_v43, %v965_v39  ;;  %v975_v34 = vunpack.c.l.bf16 %v971_v2  ;;  %v976_v51 = vunpack.c.h.bf16 %v971_v2  ;;  %v850_v53 = vpack.c.bf16 %v843_v12, %v842_v11  ;;  %v996_v39 = vld [vmem:[#allocation3 + $0xc] sm:$0xf] }
  0x9f   : > { %v851_v37 = vpack.c.bf16 %v845_v30, %v844_v44  ;;  %v1135_v38 = vshra.s32 %v2244_v5, 20  ;;  %v1136_v42 = vshra.s32 %v2251_v10, 20  ;;  %v1141_v13 = vand.u32 15, %v1133_v48 }
  0xa0   : > { %v977_v57 = vunpack.c.l.bf16 %v972_v50  ;;  %v983_v46 = vmul.f32 %v975_v34, %v2358_v25  ;;  %v978_v58 = vunpack.c.h.bf16 %v972_v50  ;;  %v984_v1 = vmul.f32 %v976_v51, %v2362_v47 }
  0xa1   : > { %v854_v61 = vunpack.c.l.bf16 %v850_v53  ;;  %v855_v7 = vunpack.c.h.bf16 %v850_v53  ;;  %v856_v6 = vunpack.c.l.bf16 %v851_v37  ;;  %v857_v8 = vunpack.c.h.bf16 %v851_v37 }
  0xa2   : > { %v985_v3 = vmul.f32 %v977_v57, %v2360_v26  ;;  %v986_v9 = vmul.f32 %v978_v58, %v2368_v54  ;;  %v1142_v14 = vand.u32 15, %v1134_v52  ;;  %v1143_v23 = vand.u32 15, %v1135_v38 }
  0xa3   : > { %v862_v15 = vsub.f32 %v854_v61, %v2370_v59  ;;  %v863_v17 = vsub.f32 %v855_v7, %v2372_v60  ;;  %v864_v18 = vsub.f32 %v856_v6, %v2375_v62  ;;  %v865_v19 = vsub.f32 %v857_v8, %v2377_v63 }
  0xa4   : > { %v991_v20 = vpack.c.bf16 %v985_v3, %v983_v46  ;;  %v992_v21 = vpack.c.bf16 %v986_v9, %v984_v1  ;;  %v1144_v24 = vand.u32 15, %v1136_v42  ;;  %v1149_v22 = vcvt.s32.f32 %v1141_v13  ;;  %v895_v9 = vld [vmem:[#allocation3 + $0x8] sm:$0xf] }
  0xa5   : > { %v870_v27 = vpack.c.bf16 %v863_v17, %v862_v15  ;;  %v871_v32 = vpack.c.bf16 %v865_v19, %v864_v18  ;;  %v1150_v33 = vcvt.s32.f32 %v1142_v14  ;;  %v1151_v43 = vcvt.s32.f32 %v1143_v23 }
  0xa6   : > { %1007 = vmatpush.bf16.msrb.mxu2 %v991_v20  ;;  %1020 = vmatpush.bf16.msrb.mxu3 %v992_v21  ;;  %v1152_v2 = vcvt.s32.f32 %v1144_v24  ;;  %v1032_v11 = vshra.s32 %v2233_v0, 16  ;;  %v1033_v12 = vshra.s32 %v2241_v4, 16  ;;  %v1034_v52 = vshra.s32 %v2244_v5, 16 }
  0xa7   : > { %v874_v44 = vunpack.c.l.bf16 %v870_v27  ;;  %v876_v30 = vunpack.c.l.bf16 %v871_v32  ;;  %v875_v48 = vunpack.c.h.bf16 %v870_v27  ;;  %v877_v50 = vunpack.c.h.bf16 %v871_v32 }
  0xa8   : > { %v1155_v34 = vpack.c.bf16 %v1150_v33, %v1149_v22  ;;  %v1156_v51 = vpack.c.bf16 %v1152_v2, %v1151_v43  ;;  %v1035_v53 = vshra.s32 %v2251_v10, 16  ;;  %v1040_v61 = vand.u32 15, %v1032_v11 }
  0xa9   : > { %v882_v37 = vmul.f32 %v874_v44, %v2358_v25  ;;  %v884_v38 = vmul.f32 %v876_v30, %v2360_v26  ;;  %v883_v42 = vmul.f32 %v875_v48, %v2362_v47  ;;  %v885_v0 = vmul.f32 %v877_v50, %v2368_v54  ;;  %1666 = vmatmul.msk.bf16.vlgmr.msrb.gmra.mxu2 %vm693_vm6, %v996_v39 }
  0xaa   : > { %1667 = vmatmul.msk.bf16.vlgmr.msrb.gmra.mxu3 %vm693_vm6, %v996_v39  ;;  %v1161_v4 = vunpack.c.l.bf16 %v1155_v34  ;;  %v1162_v57 = vunpack.c.h.bf16 %v1155_v34  ;;  %v1163_v46 = vunpack.c.l.bf16 %v1156_v51  ;;  %v1164_v58 = vunpack.c.h.bf16 %v1156_v51 }
  0xab   : > { %v890_v1 = vpack.c.bf16 %v884_v38, %v882_v37  ;;  %v891_v5 = vpack.c.bf16 %v885_v0, %v883_v42  ;;  %v1041_v10 = vand.u32 15, %v1033_v12  ;;  %v1042_v13 = vand.u32 15, %v1034_v52 }
  0xac   : > { %v1169_v7 = vsub.f32 %v1161_v4, %v2294_v35  ;;  %v1170_v6 = vsub.f32 %v1162_v57, %v2296_v36  ;;  %v1171_v8 = vsub.f32 %v1163_v46, %v2302_v45  ;;  %v1172_v3 = vsub.f32 %v1164_v58, %v2304_v29 }
  0xad   : > { %906 = vmatpush.bf16.msrb.mxu0 %v890_v1  ;;  %919 = vmatpush.bf16.msrb.mxu1 %v891_v5  ;;  %v1043_v14 = vand.u32 15, %v1035_v53  ;;  %v1048_v15 = vcvt.s32.f32 %v1040_v61  ;;  %v1049_v17 = vcvt.s32.f32 %v1041_v10  ;;  %v1129_v20 = vshra.s32 %v2333_v16, 20 }
  0xae   : > { %v1175_v18 = vpack.c.bf16 %v1170_v6, %v1169_v7  ;;  %v1176_v19 = vpack.c.bf16 %v1172_v3, %v1171_v8  ;;  %v1130_v21 = vshra.s32 %v2346_v49, 20  ;;  %v1050_v23 = vcvt.s32.f32 %v1042_v13 }
  0xaf   : > { %v1051_v24 = vcvt.s32.f32 %v1043_v14  ;;  %v1054_v27 = vpack.c.bf16 %v1049_v17, %v1048_v15  ;;  %v1131_v32 = vshra.s32 %v2351_v55, 20  ;;  %v1132_v44 = vshra.s32 %v2354_v56, 20 }
  0xb0   : > { %1664 = vmatmul.msk.bf16.vlgmr.msrb.gmra.mxu0 %vm693_vm6, %v895_v9  ;;  %1665 = vmatmul.msk.bf16.vlgmr.msrb.gmra.mxu1 %vm693_vm6, %v895_v9  ;;  %v1181_v22 = vunpack.c.l.bf16 %v1175_v18  ;;  %v1183_v33 = vunpack.c.l.bf16 %v1176_v19  ;;  %v1182_v39 = vunpack.c.h.bf16 %v1175_v18  ;;  %v1184_v43 = vunpack.c.h.bf16 %v1176_v19 }
  0xb1   : > { %v1055_v2 = vpack.c.bf16 %v1051_v24, %v1050_v23  ;;  %v1060_v11 = vunpack.c.l.bf16 %v1054_v27  ;;  %v1061_v12 = vunpack.c.h.bf16 %v1054_v27  ;;  %v1137_v0 = vand.u32 15, %v1129_v20 }
  0xb2   : > { %v1189_v30 = vmul.f32 %v1181_v22, %v2290_v28  ;;  %v1191_v48 = vmul.f32 %v1183_v33, %v2298_v40  ;;  %v1190_v50 = vmul.f32 %v1182_v39, %v2292_v31  ;;  %v1192_v34 = vmul.f32 %v1184_v43, %v2300_v41 }
  0xb3   : > { %v1062_v51 = vunpack.c.l.bf16 %v1055_v2  ;;  %v1063_v52 = vunpack.c.h.bf16 %v1055_v2  ;;  %v1068_v53 = vsub.f32 %v1060_v11, %v2294_v35  ;;  %v1069_v37 = vsub.f32 %v1061_v12, %v2296_v36 }
  0xb4   : > { %v1195_v38 = vpack.c.bf16 %v1191_v48, %v1189_v30  ;;  %v1196_v42 = vpack.c.bf16 %v1192_v34, %v1190_v50  ;;  %v1138_v4 = vand.u32 15, %v1130_v21  ;;  %v1139_v1 = vand.u32 15, %v1131_v32 }
  0xb5   : > { %v1070_v57 = vsub.f32 %v1062_v51, %v2302_v45  ;;  %v1071_v46 = vsub.f32 %v1063_v52, %v2304_v29  ;;  %v1074_v58 = vpack.c.bf16 %v1069_v37, %v1068_v53  ;;  %v1140_v5 = vand.u32 15, %v1132_v44 }
  0xb6   : > { %1208 = vmatpush.bf16.msra.mxu2 %v1195_v38  ;;  %1221 = vmatpush.bf16.msra.mxu3 %v1196_v42  ;;  %v1145_v61 = vcvt.s32.f32 %v1137_v0  ;;  %v1146_v10 = vcvt.s32.f32 %v1138_v4  ;;  %v1028_v7 = vshra.s32 %v2333_v16, 16  ;;  %v1147_v9 = vcvt.s32.f32 %v1139_v1  ;;  %v2487_v4 = vld [vmem:[%s2221_s14 + $0x20] sm:$0xff] }
  0xb7   : > { %v1075_v6 = vpack.c.bf16 %v1071_v46, %v1070_v57  ;;  %v1080_v8 = vunpack.c.l.bf16 %v1074_v58  ;;  %v1081_v3 = vunpack.c.h.bf16 %v1074_v58  ;;  %v1148_v13 = vcvt.s32.f32 %v1140_v5  ;;  %v1787_v5 = vld [vmem:[%s2221_s14 + $0x28] sm:$0xff] }
  0xb8   : > { %v1153_v14 = vpack.c.bf16 %v1146_v10, %v1145_v61  ;;  %v1029_v15 = vshra.s32 %v2346_v49, 16  ;;  %v1030_v17 = vshra.s32 %v2351_v55, 16  ;;  %v1031_v32 = vshra.s32 %v2354_v56, 16 }
  0xb9   : > { %v1082_v18 = vunpack.c.l.bf16 %v1075_v6  ;;  %v1088_v19 = vmul.f32 %v1080_v8, %v2290_v28  ;;  %v1083_v20 = vunpack.c.h.bf16 %v1075_v6  ;;  %v1089_v21 = vmul.f32 %v1081_v3, %v2292_v31  ;;  %v1788_v6 = vld [vmem:[%s2221_s14 + $0x30] sm:$0xff]  ;;  %v1789_v3 = vld [vmem:[%s2221_s14 + $0x38] sm:$0xff] }
  0xba   : > { %v1154_v23 = vpack.c.bf16 %v1148_v13, %v1147_v9  ;;  %v1157_v24 = vunpack.c.l.bf16 %v1153_v14  ;;  %v1158_v27 = vunpack.c.h.bf16 %v1153_v14  ;;  %v1036_v39 = vand.u32 15, %v1028_v7 }
  0xbb   : > { %v1090_v22 = vmul.f32 %v1082_v18, %v2298_v40  ;;  %v1091_v33 = vmul.f32 %v1083_v20, %v2300_v41  ;;  %v1037_v43 = vand.u32 15, %v1029_v15  ;;  %v1038_v50 = vand.u32 15, %v1030_v17 }
  0xbc   : > { %v1159_v2 = vunpack.c.l.bf16 %v1154_v23  ;;  %v1160_v11 = vunpack.c.h.bf16 %v1154_v23  ;;  %v1165_v12 = vsub.f32 %v1157_v24, %v2370_v59  ;;  %v1166_v44 = vsub.f32 %v1158_v27, %v2372_v60 }
  0xbd   : > { %v1094_v30 = vpack.c.bf16 %v1090_v22, %v1088_v19  ;;  %v1095_v48 = vpack.c.bf16 %v1091_v33, %v1089_v21  ;;  %v1039_v34 = vand.u32 15, %v1031_v32  ;;  %v1044_v37 = vcvt.s32.f32 %v1036_v39 }
  0xbe   : > { %v1167_v51 = vsub.f32 %v1159_v2, %v2375_v62  ;;  %v1168_v52 = vsub.f32 %v1160_v11, %v2377_v63  ;;  %v1173_v53 = vpack.c.bf16 %v1166_v44, %v1165_v12  ;;  %v1045_v38 = vcvt.s32.f32 %v1037_v43 }
  0xbf   : > { %1107 = vmatpush.bf16.msra.mxu0 %v1094_v30  ;;  %1120 = vmatpush.bf16.msra.mxu1 %v1095_v48  ;;  %v1046_v42 = vcvt.s32.f32 %v1038_v50  ;;  %v1047_v0 = vcvt.s32.f32 %v1039_v34  ;;  %v1678_v57 = vshrl.u32 %v2487_v4, 28  ;;  %v1679_v61 = vshrl.u32 %v1787_v5, 28 }
  0xc0   : > { %v1174_v46 = vpack.c.bf16 %v1168_v52, %v1167_v51  ;;  %v1177_v58 = vunpack.c.l.bf16 %v1173_v53  ;;  %v1178_v1 = vunpack.c.h.bf16 %v1173_v53  ;;  %v1052_v10 = vpack.c.bf16 %v1045_v38, %v1044_v37  ;;  %v1198_v51 = vld [vmem:[#allocation3 + $0x14] sm:$0xf] }
  0xc1   : > { %v1053_v7 = vpack.c.bf16 %v1047_v0, %v1046_v42  ;;  %v1680_v8 = vshrl.u32 %v1788_v6, 28  ;;  %v1681_v9 = vshrl.u32 %v1789_v3, 28  ;;  %v1351_v27 = vcvt.s32.f32 %v1678_v57 }
  0xc2   : > { %v1179_v13 = vunpack.c.l.bf16 %v1174_v46  ;;  %v1185_v14 = vmul.f32 %v1177_v58, %v2358_v25  ;;  %v1180_v15 = vunpack.c.h.bf16 %v1174_v46  ;;  %v1186_v17 = vmul.f32 %v1178_v1, %v2362_v47 }
  0xc3   : > { %v1056_v18 = vunpack.c.l.bf16 %v1052_v10  ;;  %v1057_v19 = vunpack.c.h.bf16 %v1052_v10  ;;  %v1058_v20 = vunpack.c.l.bf16 %v1053_v7  ;;  %v1059_v21 = vunpack.c.h.bf16 %v1053_v7 }
  0xc4   : > { %v1187_v23 = vmul.f32 %v1179_v13, %v2360_v26  ;;  %v1188_v24 = vmul.f32 %v1180_v15, %v2368_v54  ;;  %v1352_v32 = vcvt.s32.f32 %v1679_v61  ;;  %v1353_v12 = vcvt.s32.f32 %v1680_v8 }
  0xc5   : > { %v1064_v22 = vsub.f32 %v1056_v18, %v2370_v59  ;;  %v1065_v33 = vsub.f32 %v1057_v19, %v2372_v60  ;;  %v1066_v39 = vsub.f32 %v1058_v20, %v2375_v62  ;;  %v1067_v43 = vsub.f32 %v1059_v21, %v2377_v63 }
  0xc6   : > { %v1193_v2 = vpack.c.bf16 %v1187_v23, %v1185_v14  ;;  %v1194_v11 = vpack.c.bf16 %v1188_v24, %v1186_v17  ;;  %v1354_v44 = vcvt.s32.f32 %v1681_v9  ;;  %v1357_v50 = vpack.c.bf16 %v1352_v32, %v1351_v27  ;;  %v1097_v24 = vld [vmem:[#allocation3 + $0x10] sm:$0xf] }
  0xc7   : > { %v1072_v30 = vpack.c.bf16 %v1065_v33, %v1064_v22  ;;  %v1073_v48 = vpack.c.bf16 %v1067_v43, %v1066_v39  ;;  %v1234_v34 = vshra.s32 %v2487_v4, 24  ;;  %v1235_v53 = vshra.s32 %v1787_v5, 24 }
  0xc8   : > { %1209 = vmatpush.bf16.msra.mxu2 %v1193_v2  ;;  %1222 = vmatpush.bf16.msra.mxu3 %v1194_v11  ;;  %v1358_v52 = vpack.c.bf16 %v1354_v44, %v1353_v12  ;;  %v1236_v37 = vshra.s32 %v1788_v6, 24  ;;  %v1237_v38 = vshra.s32 %v1789_v3, 24  ;;  %v1363_v58 = vunpack.c.l.bf16 %v1357_v50 }
  0xc9   : > { %v1076_v42 = vunpack.c.l.bf16 %v1072_v30  ;;  %v1078_v0 = vunpack.c.l.bf16 %v1073_v48  ;;  %v1077_v57 = vunpack.c.h.bf16 %v1072_v30  ;;  %v1079_v46 = vunpack.c.h.bf16 %v1073_v48 }
  0xca   : > { %v1364_v1 = vunpack.c.h.bf16 %v1357_v50  ;;  %v1365_v61 = vunpack.c.l.bf16 %v1358_v52  ;;  %v1366_v10 = vunpack.c.h.bf16 %v1358_v52  ;;  %v1371_v5 = vsub.f32 %v1363_v58, %v2294_v35 }
  0xcb   : > { %v1084_v7 = vmul.f32 %v1076_v42, %v2358_v25  ;;  %v1086_v8 = vmul.f32 %v1078_v0, %v2360_v26  ;;  %v1085_v4 = vmul.f32 %v1077_v57, %v2362_v47  ;;  %v1087_v9 = vmul.f32 %v1079_v46, %v2368_v54  ;;  %1670 = vmatmul.msk.bf16.vlgmr.msra.gmra.mxu2 %vm693_vm6, %v1198_v51 }
  0xcc   : > { %1671 = vmatmul.msk.bf16.vlgmr.msra.gmra.mxu3 %vm693_vm6, %v1198_v51  ;;  %v1372_v6 = vsub.f32 %v1364_v1, %v2296_v36  ;;  %v1373_v3 = vsub.f32 %v1365_v61, %v2302_v45  ;;  %v1374_v13 = vsub.f32 %v1366_v10, %v2304_v29  ;;  %v1242_v17 = vand.u32 15, %v1234_v34 }
  0xcd   : > { %v1092_v14 = vpack.c.bf16 %v1086_v8, %v1084_v7  ;;  %v1093_v15 = vpack.c.bf16 %v1087_v9, %v1085_v4  ;;  %v1243_v18 = vand.u32 15, %v1235_v53  ;;  %v1244_v21 = vand.u32 15, %v1236_v37 }
  0xce   : > { %v1377_v19 = vpack.c.bf16 %v1372_v6, %v1371_v5  ;;  %v1378_v20 = vpack.c.bf16 %v1374_v13, %v1373_v3  ;;  %v1245_v23 = vand.u32 15, %v1237_v38  ;;  %v1250_v27 = vcvt.s32.f32 %v1242_v17 }
  0xcf   : > { %1108 = vmatpush.bf16.msra.mxu0 %v1092_v14  ;;  %1121 = vmatpush.bf16.msra.mxu1 %v1093_v15  ;;  %v1251_v32 = vcvt.s32.f32 %v1243_v18  ;;  %v1674_v22 = vshrl.u32 %v2333_v16, 28  ;;  %v1675_v33 = vshrl.u32 %v2346_v49, 28  ;;  %v1252_v12 = vcvt.s32.f32 %v1244_v21 }
  0xd0   : > { %v1383_v39 = vunpack.c.l.bf16 %v1377_v19  ;;  %v1385_v43 = vunpack.c.l.bf16 %v1378_v20  ;;  %v1384_v2 = vunpack.c.h.bf16 %v1377_v19  ;;  %v1386_v11 = vunpack.c.h.bf16 %v1378_v20 }
  0xd1   : > { %v1253_v44 = vcvt.s32.f32 %v1245_v23  ;;  %v1256_v30 = vpack.c.bf16 %v1251_v32, %v1250_v27  ;;  %v1676_v48 = vshrl.u32 %v2351_v55, 28  ;;  %v1677_v52 = vshrl.u32 %v2354_v56, 28 }
  0xd2   : > { %1668 = vmatmul.msk.bf16.vlgmr.msra.gmra.mxu0 %vm693_vm6, %v1097_v24  ;;  %1669 = vmatmul.msk.bf16.vlgmr.msra.gmra.mxu1 %vm693_vm6, %v1097_v24  ;;  %v1391_v50 = vmul.f32 %v1383_v39, %v2290_v28  ;;  %v1393_v34 = vmul.f32 %v1385_v43, %v2298_v40  ;;  %v1392_v51 = vmul.f32 %v1384_v2, %v2292_v31  ;;  %v1347_v57 = vcvt.s32.f32 %v1674_v22 }
  0xd3   : > { %v1394_v53 = vmul.f32 %v1386_v11, %v2300_v41  ;;  %v1257_v37 = vpack.c.bf16 %v1253_v44, %v1252_v12  ;;  %v1262_v38 = vunpack.c.l.bf16 %v1256_v30  ;;  %v1263_v42 = vunpack.c.h.bf16 %v1256_v30 }
  0xd4   : > { %v1397_v0 = vpack.c.bf16 %v1393_v34, %v1391_v50  ;;  %v1348_v46 = vcvt.s32.f32 %v1675_v33  ;;  %v1349_v58 = vcvt.s32.f32 %v1676_v48  ;;  %v1350_v4 = vcvt.s32.f32 %v1677_v52 }
  0xd5   : > { %v1398_v1 = vpack.c.bf16 %v1394_v53, %v1392_v51  ;;  %v1264_v61 = vunpack.c.l.bf16 %v1257_v37  ;;  %v1265_v10 = vunpack.c.h.bf16 %v1257_v37  ;;  %v1270_v7 = vsub.f32 %v1262_v38, %v2294_v35 }
  0xd6   : > { %1410 = vmatpush.bf16.msrb.mxu2 %v1397_v0  ;;  %v1271_v8 = vsub.f32 %v1263_v42, %v2296_v36  ;;  %v1355_v9 = vpack.c.bf16 %v1348_v46, %v1347_v57  ;;  %v1230_v5 = vshra.s32 %v2333_v16, 24  ;;  %v1231_v13 = vshra.s32 %v2346_v49, 24 }
  0xd7   : > { %1423 = vmatpush.bf16.msrb.mxu3 %v1398_v1  ;;  %v1272_v6 = vsub.f32 %v1264_v61, %v2302_v45  ;;  %v1273_v3 = vsub.f32 %v1265_v10, %v2304_v29  ;;  %v1232_v14 = vshra.s32 %v2351_v55, 24  ;;  %v1356_v17 = vpack.c.bf16 %v1350_v4, %v1349_v58 }
  0xd8   : > { %v1276_v15 = vpack.c.bf16 %v1271_v8, %v1270_v7  ;;  %v1359_v18 = vunpack.c.l.bf16 %v1355_v9  ;;  %v1360_v35 = vunpack.c.h.bf16 %v1355_v9  ;;  %v1233_v36 = vshra.s32 %v2354_v56, 24 }
  0xd9   : > { %v1277_v19 = vpack.c.bf16 %v1273_v3, %v1272_v6  ;;  %v1238_v20 = vand.u32 15, %v1230_v5  ;;  %v1239_v21 = vand.u32 15, %v1231_v13  ;;  %v1361_v24 = vunpack.c.l.bf16 %v1356_v17  ;;  %v1400_v6 = vld [vmem:[#allocation3 + $0x1c] sm:$0xf] }
  0xda   : > { %v1282_v23 = vunpack.c.l.bf16 %v1276_v15  ;;  %v1283_v16 = vunpack.c.h.bf16 %v1276_v15  ;;  %v1362_v27 = vunpack.c.h.bf16 %v1356_v17  ;;  %v1367_v29 = vsub.f32 %v1359_v18, %v2370_v59 }
  0xdb   : > { %v1284_v45 = vunpack.c.l.bf16 %v1277_v19  ;;  %v1285_v32 = vunpack.c.h.bf16 %v1277_v19  ;;  %v1368_v49 = vsub.f32 %v1360_v35, %v2372_v60  ;;  %v1369_v33 = vsub.f32 %v1361_v24, %v2375_v62 }
  0xdc   : > { %v1290_v55 = vmul.f32 %v1282_v23, %v2290_v28  ;;  %v1291_v22 = vmul.f32 %v1283_v16, %v2292_v31  ;;  %v1370_v56 = vsub.f32 %v1362_v27, %v2377_v63  ;;  %v1240_v11 = vand.u32 15, %v1232_v14 }
  0xdd   : > { %v1292_v39 = vmul.f32 %v1284_v45, %v2298_v40  ;;  %v1293_v43 = vmul.f32 %v1285_v32, %v2300_v41  ;;  %v1375_v2 = vpack.c.bf16 %v1368_v49, %v1367_v29  ;;  %v1241_v44 = vand.u32 15, %v1233_v36  ;;  %v1299_v36 = vld [vmem:[#allocation3 + $0x18] sm:$0xf] }
  0xde   : > { %v1376_v12 = vpack.c.bf16 %v1370_v56, %v1369_v33  ;;  %v1246_v30 = vcvt.s32.f32 %v1238_v20  ;;  %v1247_v48 = vcvt.s32.f32 %v1239_v21  ;;  %v1248_v53 = vcvt.s32.f32 %v1240_v11 }
  0xdf   : > { %v1296_v50 = vpack.c.bf16 %v1292_v39, %v1290_v55  ;;  %v1297_v34 = vpack.c.bf16 %v1293_v43, %v1291_v22  ;;  %v1379_v51 = vunpack.c.l.bf16 %v1375_v2  ;;  %v1380_v28 = vunpack.c.h.bf16 %v1375_v2 }
  0xe0   : > { %v1381_v52 = vunpack.c.l.bf16 %v1376_v12  ;;  %v1382_v31 = vunpack.c.h.bf16 %v1376_v12  ;;  %v1249_v37 = vcvt.s32.f32 %v1241_v44  ;;  %v1254_v38 = vpack.c.bf16 %v1247_v48, %v1246_v30 }
  0xe1   : > { %1309 = vmatpush.bf16.msrb.mxu0 %v1296_v50  ;;  %1322 = vmatpush.bf16.msrb.mxu1 %v1297_v34  ;;  %v1387_v40 = vmul.f32 %v1379_v51, %v2358_v25  ;;  %v1388_v41 = vmul.f32 %v1380_v28, %v2362_v47  ;;  %v1439_v50 = vld [vmem:[%s364_s13] sm:$0x3] }
  0xe2   : > { %v1389_v42 = vmul.f32 %v1381_v52, %v2360_v26  ;;  %v1390_v0 = vmul.f32 %v1382_v31, %v2368_v54  ;;  %v1255_v57 = vpack.c.bf16 %v1249_v37, %v1248_v53  ;;  %v1258_v46 = vunpack.c.l.bf16 %v1254_v38 }
  0xe3   : > { %v1259_v58 = vunpack.c.h.bf16 %v1254_v38  ;;  %v1440_v28 = vunpack.c.l.bf16 %v1439_v50 }
  0xe4   : > { %v1395_v1 = vpack.c.bf16 %v1389_v42, %v1387_v40  ;;  %v1396_v61 = vpack.c.bf16 %v1390_v0, %v1388_v41  ;;  %v1260_v10 = vunpack.c.l.bf16 %v1255_v57  ;;  %v1261_v7 = vunpack.c.h.bf16 %v1255_v57 }
  0xe5   : > { %v1266_v8 = vsub.f32 %v1258_v46, %v2370_v59  ;;  %v1267_v4 = vsub.f32 %v1259_v58, %v2372_v60  ;;  %v1442_v38 = vperm.slane %v1440_v28, 0  ;;  %v1443_v42 = vperm.slane %v1440_v28, 2 }
  0xe6   : > { %1411 = vmatpush.bf16.msrb.mxu2 %v1395_v1  ;;  %1424 = vmatpush.bf16.msrb.mxu3 %v1396_v61  ;;  %v1268_v9 = vsub.f32 %v1260_v10, %v2375_v62  ;;  %v1269_v5 = vsub.f32 %v1261_v7, %v2377_v63 }
  0xe7   : > { %v1274_v3 = vpack.c.bf16 %v1267_v4, %v1266_v8  ;;  %v1446_v10 = vperm.slane %v1442_v38, 0  ;;  %v1447_v7 = vperm.slane %v1443_v42, 0 }
  0xe8   : > { %v1275_v13 = vpack.c.bf16 %v1269_v5, %v1268_v9 }
  0xe9   : > { %v1278_v14 = vunpack.c.l.bf16 %v1274_v3  ;;  %v1279_v15 = vunpack.c.h.bf16 %v1274_v3  ;;  %1682 = vmatmul.msk.bf16.vlgmr.msrb.gmra.mxu2 %vm693_vm6, %v1400_v6  ;;  %1683 = vmatmul.msk.bf16.vlgmr.msrb.gmra.mxu3 %vm693_vm6, %v1400_v6 }
  0xea   : > { %v1280_v17 = vunpack.c.l.bf16 %v1275_v13  ;;  %v1281_v18 = vunpack.c.h.bf16 %v1275_v13 }
  0xeb   : > { %v1286_v59 = vmul.f32 %v1278_v14, %v2358_v25  ;;  %v1287_v60 = vmul.f32 %v1279_v15, %v2362_v47 }
  0xec   : > { %v1288_v35 = vmul.f32 %v1280_v17, %v2360_v26  ;;  %v1289_v62 = vmul.f32 %v1281_v18, %v2368_v54 }
  0xee   : > { %v1294_v63 = vpack.c.bf16 %v1288_v35, %v1286_v59  ;;  %v1295_v19 = vpack.c.bf16 %v1289_v62, %v1287_v60 }
  0xf0   : > { %1310 = vmatpush.bf16.msrb.mxu0 %v1294_v63  ;;  %1323 = vmatpush.bf16.msrb.mxu1 %v1295_v19 }
  0xf3   : > { %1672 = vmatmul.msk.bf16.vlgmr.msrb.gmra.mxu0 %vm693_vm6, %v1299_v36  ;;  %1673 = vmatmul.msk.bf16.vlgmr.msrb.gmra.mxu1 %vm693_vm6, %v1299_v36 }
 0x105   : > { %v706_v20 = vpop.f32.mrf.mxu0 }
 0x106   : > { %v719_v21 = vpop.f32.mrf.mxu1 }
 0x10d   : > { %v708_v23 = vpop.f32.mrf.mxu0 }
 0x10e   : > { %v721_v16 = vpop.f32.mrf.mxu1 }
 0x111   : > { %v807_v25 = vpop.f32.mrf.mxu2  ;;  %v820_v24 = vpop.f32.mrf.mxu3 }
 0x112   : > { %v824_v47 = vadd.f32 %v807_v25, %v706_v20  ;;  %v825_v27 = vadd.f32 %v820_v24, %v719_v21 }
 0x119   : > { %v809_v26 = vpop.f32.mrf.mxu2  ;;  %v822_v45 = vpop.f32.mrf.mxu3 }
 0x12c   : > { %v1009_v54 = vpop.f32.mrf.mxu2 }
 0x12d   : > { %v908_v32 = vpop.f32.mrf.mxu0  ;;  %v921_v29 = vpop.f32.mrf.mxu1 }
 0x12e   : > { %v1022_v49 = vpop.f32.mrf.mxu3  ;;  %v925_v34 = vadd.f32 %v908_v32, %v824_v47  ;;  %v926_v51 = vadd.f32 %v921_v29, %v825_v27 }
 0x130   : > { %v1026_v52 = vadd.f32 %v1009_v54, %v925_v34  ;;  %v1027_v31 = vadd.f32 %v1022_v49, %v926_v51 }
 0x134   : > { %v1011_v55 = vpop.f32.mrf.mxu2 }
 0x135   : > { %v910_v22 = vpop.f32.mrf.mxu0  ;;  %v923_v33 = vpop.f32.mrf.mxu1 }
 0x136   : > { %v1024_v56 = vpop.f32.mrf.mxu3 }
 0x14e   : > { %v1211_v39 = vpop.f32.mrf.mxu2 }
 0x14f   : > { %v1110_v43 = vpop.f32.mrf.mxu0  ;;  %v1123_v2 = vpop.f32.mrf.mxu1 }
 0x150   : > { %v1224_v11 = vpop.f32.mrf.mxu3  ;;  %v1127_v40 = vadd.f32 %v1110_v43, %v1026_v52  ;;  %v1128_v41 = vadd.f32 %v1123_v2, %v1027_v31 }
 0x152   : > { %v1228_v0 = vadd.f32 %v1211_v39, %v1127_v40  ;;  %v1229_v57 = vadd.f32 %v1224_v11, %v1128_v41 }
 0x156   : > { %v1213_v12 = vpop.f32.mrf.mxu2 }
 0x157   : > { %v1112_v44 = vpop.f32.mrf.mxu0  ;;  %v1125_v30 = vpop.f32.mrf.mxu1 }
 0x158   : > { %v1226_v48 = vpop.f32.mrf.mxu3 }
 0x16c   : > { %v1413_v53 = vpop.f32.mrf.mxu2  ;;  %v1426_v37 = vpop.f32.mrf.mxu3 }
 0x170   : > { %v1312_v46 = vpop.f32.mrf.mxu0  ;;  %v1325_v58 = vpop.f32.mrf.mxu1 }
 0x171   : > { %v1329_v1 = vadd.f32 %v1312_v46, %v1228_v0  ;;  %v1330_v61 = vadd.f32 %v1325_v58, %v1229_v57 }
 0x173   : > { %v1430_v8 = vadd.f32 %v1413_v53, %v1329_v1  ;;  %v1431_v4 = vadd.f32 %v1426_v37, %v1330_v61 }
 0x174   : > { %v1415_v9 = vpop.f32.mrf.mxu2  ;;  %v1428_v5 = vpop.f32.mrf.mxu3 }
 0x175   : > { %v1448_v6 = vadd.f32 %v1446_v10, %v1430_v8  ;;  %v1449_v3 = vadd.f32 %v1447_v7, %v1431_v4 }
 0x177   : > { %v1450_v13 = vpack.c.bf16 %v1449_v3, %v1448_v6 }
 0x178   : > { %v1314_v14 = vpop.f32.mrf.mxu0  ;;  %v1327_v15 = vpop.f32.mrf.mxu1 }
 0x179   : > { %1451 = vst [vmem:[%s406_s10] sm:$0xff] %v1450_v13 }
 0x17a   : > { %1967 = shalt.err (!%p1964_p13)
}
 0x17b   : > { %1705 = dma.vmem_to_hbm [thread:$0]  (%p2176_p0), %s1467_s21, 128, %s1469_s12, %s1453_s16  }
 0x17c PF: > { %s2622_s2 = sld [smem:[#allocation18_spill]]  ;;  %s1480_s14 = sand.u32 1, %s2010_s18  }
 0x17d   : > { %p1725_p4 = pnand %p1637_p3, %p2180_p2  ;;  %s1481_s20 = scalar_lea.sflag [#allocation5], %s1480_s14 }
 0x17f   : > { %p1726_p5 = pneg %p1725_p4 }
 0x181   : > { %2005 = dma.done.wait (%p1726_p5), %s1481_s20, 128  }
 0x182   : > { %2007 = vsyncadd (%p1726_p5), %s1481_s20, 4294967168  ;;  %s25_s23 = sadd.s32 1, %s2622_s2   ;;  %s2623_s15 = sld [smem:[#allocation17_spill]] }
 0x183   : > { %p22_p1 = scmp.ge.s32.totalorder %s25_s23, 4   ;;  %s2624_s20 = sld [smem:[#allocation20_spill]] }
 0x184   : > { %s2625_s24 = sld [smem:[#allocation19_spill]]  ;;  %s2626_s18 = smov %s2014_s19 }
 0x185   : > { %s2628_s21 = smov %s2026_s22 }
 0x186   :  { %24 = sbr.rel (!%p22_p1) target bundleno = 14 (0xe), region = 141 }
 0x188   : > { %s2627_s19 = smov %s2623_s15 }
 0x18a   : > { %s2629_s22 = smov %s2625_s24 }
 0x18b   :  { %1487 = vsyncpa [#allocation4], 1 }
 0x18c   :  { %1489 = vsyncpa [#allocation4 + $0x1], 1 }
 0x18d   :  { %1490 = vsyncpa [#allocation7], 1 }
 0x18e   :  { %1492 = vsyncpa [#allocation7 + $0x1], 1 }
 0x18f   :  { %1493 = vsyncpa [#allocation10], 1 }
 0x190   :  { %1495 = vsyncpa [#allocation10 + $0x1], 1 }
 0x191   :  { %1496 = vsyncpa [#allocation5], 1 }
 0x192   :  { %1498 = vsyncpa [#allocation5 + $0x1], 1 }

</bundles_post_ra>
